<compile_context>
chip_gen: v7x
topology: tpu7x:2x2x1
jax: 0.10.0
libtpu: 0.0.40
codegen_flags: <defaults>
</compile_context>

<pallas_src>
import functools

import jax
import jax.numpy as jnp
from jax import lax
from jax.experimental import pallas as pl
from jax.experimental.pallas import tpu as pltpu


# ---------------------------------------------------------------------------
# Pallas kernel 1: fused MLP   out = relu(relu(z @ w1 + b1) @ w2_tile + b2_tile)
# ---------------------------------------------------------------------------
def _mlp_kernel(z_ref, w1_ref, b1_ref, w2_ref, b2_ref, o_ref):
    # First (tiny, K=10) matmul stays f32; recomputed per grid step so the
    # grid can be fully "parallel" (megacore-safe, no cross-step scratch dep).
    h = jnp.dot(z_ref[...], w1_ref[...], preferred_element_type=jnp.float32)
    h = jnp.maximum(h + b1_ref[...], 0.0)
    # Second matmul in bf16 on the MXU, f32 accumulate, f32 epilogue.
    acc = jnp.dot(h.astype(jnp.bfloat16), w2_ref[...],
                  preferred_element_type=jnp.float32)
    o_ref[...] = jnp.maximum(acc + b2_ref[...], 0.0).astype(o_ref.dtype)


def fused_mlp(z, w1, b1, w2, b2):
    """z:(B,Z) f32, w1:(Z,H1) f32, w2:(H1,D2) bf16 -> (B,D2) f32."""
    B, Z = z.shape
    _, H1 = w1.shape
    _, D2 = w2.shape
    TN = next((t for t in (512, 256, 128) if D2 % t == 0), D2)
    grid = (D2 // TN,)
    return pl.pallas_call(
        _mlp_kernel,
        out_shape=jax.ShapeDtypeStruct((B, D2), jnp.float32),
        grid=grid,
        in_specs=[
            pl.BlockSpec((B, Z), lambda j: (0, 0)),
            pl.BlockSpec((Z, H1), lambda j: (0, 0)),
            pl.BlockSpec((1, H1), lambda j: (0, 0)),
            pl.BlockSpec((H1, TN), lambda j: (0, j)),
            pl.BlockSpec((1, TN), lambda j: (0, j)),
        ],
        out_specs=pl.BlockSpec((B, TN), lambda j: (0, j)),
        compiler_params=pltpu.CompilerParams(
            dimension_semantics=("parallel",),
            vmem_limit_bytes=32 * 1024 * 1024),
    )(z, w1, b1.reshape(1, H1), w2, b2.reshape(1, D2))


# ---------------------------------------------------------------------------
# Pallas kernel 2: generic tiled bf16 matmul with f32 accumulator
# ---------------------------------------------------------------------------
def _matmul_kernel(x_ref, w_ref, o_ref, acc_ref):
    @pl.when(pl.program_id(2) == 0)
    def _():
        acc_ref[...] = jnp.zeros_like(acc_ref)

    acc_ref[...] += jnp.dot(x_ref[...].astype(jnp.bfloat16),
                            w_ref[...].astype(jnp.bfloat16),
                            preferred_element_type=jnp.float32)

    @pl.when(pl.program_id(2) == pl.num_programs(2) - 1)
    def _():
        o_ref[...] = acc_ref[...].astype(o_ref.dtype)


def _pick_tile(dim, candidates):
    for c in candidates:
        if dim >= c and dim % c == 0:
            return c
    return dim   # full dim is always a legal block size


def matmul_bf16(x, w):
    """x:(M,K), w:(K,N) (any float dtype; cast to bf16 in-kernel) -> (M,N) f32."""
    M, K = x.shape
    K2, N = w.shape
    assert K == K2
    TM = _pick_tile(M, (256, 128, 64, 32, 16, 8))
    TN = _pick_tile(N, (512, 256, 128))
    TK = _pick_tile(K, (512, 256, 128)) if K > 1024 else K
    # Give the megacore (v7x) at least 2 programs when cheap to do so.
    if (M // TM) * (N // TN) == 1 and M % 16 == 0 and M > 8:
        TM = M // 2
    grid = (M // TM, N // TN, K // TK)
    return pl.pallas_call(
        _matmul_kernel,
        out_shape=jax.ShapeDtypeStruct((M, N), jnp.float32),
        grid=grid,
        in_specs=[pl.BlockSpec((TM, TK), lambda i, j, k: (i, k)),
                  pl.BlockSpec((TK, TN), lambda i, j, k: (k, j))],
        out_specs=pl.BlockSpec((TM, TN), lambda i, j, k: (i, j)),
        scratch_shapes=[pltpu.VMEM((TM, TN), jnp.float32)],
        compiler_params=pltpu.CompilerParams(
            dimension_semantics=("parallel", "parallel", "arbitrary"),
            vmem_limit_bytes=32 * 1024 * 1024),
    )(x, w)


# ---------------------------------------------------------------------------
# ConvTranspose2d(k=4, s=2, p=1) epilogue: col2im overlap-add + bias + act.
# TODO(synk): this 16-slice overlap-add (on a tensor 4x the conv output) stays
# in XLA; fusing it into the matmul epilogue needs in-kernel sublane shifts.
# ---------------------------------------------------------------------------
def _col2im_bias_act(T, b, c_out, act):
    """T:(N,H,W,4,4,Cp) per-pixel/per-tap partials -> (N,2H,2W,c_out)."""
    N, H, W, K, _, _ = T.shape
    Tp = jnp.pad(T, ((0, 0), (1, 1), (1, 1), (0, 0), (0, 0), (0, 0)))
    rows = []
    for r in (0, 1):
        cols = []
        for s in (0, 1):
            acc = None
            for dh in (0, 1):
                for dw in (0, 1):
                    kh = 3 - r - 2 * dh           # oh = 2*ih - 1 + kh
                    kw = 3 - s - 2 * dw
                    t = Tp[:, r + dh:r + dh + H, s + dw:s + dw + W, kh, kw, :c_out]
                    acc = t if acc is None else acc + t
            cols.append(acc)                      # (N, H, W, c_out)
        rows.append(jnp.stack(cols, axis=3))      # (N, H, W, 2, c_out)
    y = jnp.stack(rows, axis=2)                   # (N, H, 2, W, 2, c_out)
    y = y.reshape(N, 2 * H, 2 * W, c_out) + b.reshape(1, 1, 1, c_out)
    if act == "relu":
        return jnp.maximum(y, 0.0)
    return jax.nn.sigmoid(y)


def conv_transpose2d_s2k4p1(x_nhwc, w_mat, b, c_out, act):
    """x_nhwc:(N,H,W,Cin), w_mat:(Cin, 16*Cp) bf16 -> (N,2H,2W,c_out)."""
    N, H, W, Cin = x_nhwc.shape
    Cp = w_mat.shape[1] // 16
    T = matmul_bf16(x_nhwc.reshape(N * H * W, Cin), w_mat)      # dense matmul
    T = T.reshape(N, H, W, 4, 4, Cp)
    return _col2im_bias_act(T, b, c_out, act)


# ---------------------------------------------------------------------------
# Parameter init (PyTorch-equivalent layouts) and one-time prep for the kernels
# ---------------------------------------------------------------------------
def init_decoder_params(key, img_size, latent_dim):
    C, H, _W = img_size
    h4 = H // 4
    ks = jax.random.split(key, 8)

    def u(k, shape, fan_in):
        bound = 1.0 / (fan_in ** 0.5)
        return jax.random.uniform(k, shape, jnp.float32, -bound, bound)

    return {
        "w1": u(ks[0], (latent_dim, 1024), latent_dim),
        "b1": u(ks[1], (1024,), latent_dim),
        "w2": u(ks[2], (1024, 128 * h4 * h4), 1024),
        "b2": u(ks[3], (128 * h4 * h4,), 1024),
        "wd1": u(ks[4], (128, 64, 4, 4), 128 * 16),      # ConvT: (Cin,Cout,K,K)
        "bd1": u(ks[5], (64,), 128 * 16),
        "wd2": u(ks[6], (64, C, 4, 4), 64 * 16),
        "bd2": u(ks[7], (C,), 64 * 16),
    }


def prepare_decoder_params(params, img_size):
    """One-time layout/dtype prep (done outside the hot path)."""
    C, H, _W = img_size
    h4 = H // 4
    # Permute Linear2 columns from (c,h,w) to (h,w,c) so the fused MLP output
    # is already NHWC-flat (Unflatten + transpose folded into the weights).
    perm = jnp.transpose(jnp.arange(128 * h4 * h4).reshape(128, h4, h4),
                         (1, 2, 0)).reshape(-1)

    def conv_w(w):
        Cin, Cout, K, _ = w.shape
        Cp = -(-Cout // 8) * 8                    # pad Cout so K*K*Cp % 128 == 0
        wm = jnp.transpose(w, (0, 2, 3, 1))       # (Cin, kh, kw, co)
        wm = jnp.pad(wm, ((0, 0), (0, 0), (0, 0), (0, Cp - Cout)))
        return wm.reshape(Cin, K * K * Cp).astype(jnp.bfloat16)

    return {
        "w1": params["w1"],                                   # tiny, keep f32
        "b1": params["b1"],
        "w2": params["w2"][:, perm].astype(jnp.bfloat16),
        "b2": params["b2"][perm],
        "wd1": conv_w(params["wd1"]), "bd1": params["bd1"],
        "wd2": conv_w(params["wd2"]), "bd2": params["bd2"],
    }


# ---------------------------------------------------------------------------
# Decoder forward: Linear->ReLU->Linear->ReLU->Unflatten->ConvT->ReLU->ConvT->Sigmoid
# ---------------------------------------------------------------------------
def decoder_forward(p, z, img_size):
    C, H, _W = img_size
    h4 = H // 4
    B = z.shape[0]
    x = fused_mlp(z, p["w1"], p["b1"], p["w2"], p["b2"])      # (B, h4*h4*128) NHWC
    x = x.reshape(B, h4, h4, 128)
    x = conv_transpose2d_s2k4p1(x, p["wd1"], p["bd1"], 64, "relu")      # (B,2h4,2h4,64)
    x = conv_transpose2d_s2k4p1(x, p["wd2"], p["bd2"], C, "sigmoid")    # (B,H,H,C)
    return jnp.transpose(x, (0, 3, 1, 2))                     # NCHW to match PyTorch


# Pure-JAX f32 reference (same math, XLA ops) for a correctness sanity check.
def decoder_reference(params, z, img_size):
    C, H, _W = img_size
    h4 = H // 4
    x = jax.nn.relu(z @ params["w1"] + params["b1"])
    x = jax.nn.relu(x @ params["w2"] + params["b2"])
    x = x.reshape(z.shape[0], 128, h4, h4)

    def ct(x, w, b):
        w_conv = jnp.transpose(w[:, :, ::-1, ::-1], (1, 0, 2, 3))  # OIHW
        y = lax.conv_general_dilated(
            x, w_conv, window_strides=(1, 1), padding=((2, 2), (2, 2)),
            lhs_dilation=(2, 2), dimension_numbers=("NCHW", "OIHW", "NCHW"))
        return y + b[None, :, None, None]

    x = jax.nn.relu(ct(x, params["wd1"], params["bd1"]))
    x = jax.nn.sigmoid(ct(x, params["wd2"], params["bd2"]))
    return x


if __name__ == "__main__":
    img_size = (3, 16, 16)      # (channels, height, width)
    latent_dim = 10
    batch = 2

    key = jax.random.PRNGKey(0)
    kp, kz = jax.random.split(key)
    params = init_decoder_params(kp, img_size, latent_dim)
    z = jax.random.normal(kz, (batch, latent_dim), jnp.float32)

    prepared = prepare_decoder_params(params, img_size)
    fwd = jax.jit(functools.partial(decoder_forward, img_size=img_size))
    out = jax.block_until_ready(fwd(prepared, z))

    assert out.shape == (batch, img_size[0], img_size[1], img_size[2]), out.shape

    ref = jax.block_until_ready(decoder_reference(params, z, img_size))
    max_err = float(jnp.max(jnp.abs(out - ref)))
    # bf16 MXU operands (f32 accumulate): typical max err ~1e-3.
    assert max_err < 5e-2, f"max abs error {max_err}"

    print("KERNEL_OK")
</pallas_src>

<mosaic_0001>
module attributes {stable_mosaic.version = 11 : i64} {
  func.func @_matmul_kernel(%arg0: i32, %arg1: i32, %arg2: i32, %arg3: memref<32x128xf32, #tpu.memory_space<vmem>>, %arg4: memref<128x512xbf16, #tpu.memory_space<vmem>>, %arg5: memref<32x512xf32, #tpu.memory_space<vmem>>, %arg6: memref<32x512xf32, #tpu.memory_space<vmem>>) attributes {dimension_semantics = [#tpu.dimension_semantics<parallel>, #tpu.dimension_semantics<parallel>, #tpu.dimension_semantics<arbitrary>], iteration_bounds = array<i64: 1, 2, 1>, scalar_prefetch = 0 : i64, scratch_operands = 1 : i64, tpu.core_type = #tpu.core_type<tc>, window_params = [{transform_indices = @transform_0, window_bounds = array<i64: 32, 128>}, {transform_indices = @transform_1, window_bounds = array<i64: 128, 512>}, {transform_indices = @transform_2, window_bounds = array<i64: 32, 512>}]} {
    %c0_i32 = arith.constant 0 : i32
    %0 = arith.cmpi eq, %arg2, %c0_i32 : i32
    %1 = arith.extui %0 : i1 to i32
    %c0_i32_0 = arith.constant 0 : i32
    %2 = arith.cmpi ne, %1, %c0_i32_0 : i32
    scf.if %2 {
      %cst_10 = arith.constant 0.000000e+00 : f32
      %13 = vector.broadcast %cst_10 : f32 to vector<32x512xf32>
      %c0_11 = arith.constant 0 : index
      %c0_12 = arith.constant 0 : index
      %14 = vector.load %arg6[%c0_11, %c0_12] : memref<32x512xf32, #tpu.memory_space<vmem>>, vector<32x512xf32>
      tpu.vector_store %arg6[%c0_11, %c0_12], %13 {strides = array<i32>} : memref<32x512xf32, #tpu.memory_space<vmem>>, vector<32x512xf32>,
    } else {
    }
    %c0 = arith.constant 0 : index
    %c0_1 = arith.constant 0 : index
    %3 = vector.load %arg6[%c0, %c0_1] : memref<32x512xf32, #tpu.memory_space<vmem>>, vector<32x512xf32>
    %c0_2 = arith.constant 0 : index
    %c0_3 = arith.constant 0 : index
    %4 = vector.load %arg3[%c0_2, %c0_3] : memref<32x128xf32, #tpu.memory_space<vmem>>, vector<32x128xf32>
    %5 = arith.truncf %4 : vector<32x128xf32> to vector<32x128xbf16>
    %c0_4 = arith.constant 0 : index
    %c0_5 = arith.constant 0 : index
    %6 = vector.load %arg4[%c0_4, %c0_5] : memref<128x512xbf16, #tpu.memory_space<vmem>>, vector<128x512xbf16>
    %cst = arith.constant dense<0.000000e+00> : vector<32x512xf32>
    %7 = tpu.matmul %5, %6, %cst {dimension_numbers = #tpu.dot_dimension_numbers<[1], [0], [0], [1], [0, 0, 1, 1], [], []>} : vector<32x128xbf16>, vector<128x512xbf16>, vector<32x512xf32> -> vector<32x512xf32>
    %8 = arith.addf %3, %7 : vector<32x512xf32>
    %c0_6 = arith.constant 0 : index
    %c0_7 = arith.constant 0 : index
    %9 = vector.load %arg6[%c0_6, %c0_7] : memref<32x512xf32, #tpu.memory_space<vmem>>, vector<32x512xf32>
    tpu.vector_store %arg6[%c0_6, %c0_7], %8 {strides = array<i32>} : memref<32x512xf32, #tpu.memory_space<vmem>>, vector<32x512xf32>,
    %c0_i32_8 = arith.constant 0 : i32
    %10 = arith.cmpi eq, %arg2, %c0_i32_8 : i32
    %11 = arith.extui %10 : i1 to i32
    %c0_i32_9 = arith.constant 0 : i32
    %12 = arith.cmpi ne, %11, %c0_i32_9 : i32
    scf.if %12 {
      %c0_10 = arith.constant 0 : index
      %c0_11 = arith.constant 0 : index
      %13 = vector.load %arg6[%c0_10, %c0_11] : memref<32x512xf32, #tpu.memory_space<vmem>>, vector<32x512xf32>
      %c0_12 = arith.constant 0 : index
      %c0_13 = arith.constant 0 : index
      %14 = vector.load %arg5[%c0_12, %c0_13] : memref<32x512xf32, #tpu.memory_space<vmem>>, vector<32x512xf32>
      tpu.vector_store %arg5[%c0_12, %c0_13], %13 {strides = array<i32>} : memref<32x512xf32, #tpu.memory_space<vmem>>, vector<32x512xf32>,
    } else {
    }
    return
  }
  func.func @transform_0(%arg0: i32, %arg1: i32, %arg2: i32) -> (i32, i32) {
    %c0_i32 = arith.constant 0 : i32
    return %arg0, %arg2 : i32, i32
  }
  func.func @transform_1(%arg0: i32, %arg1: i32, %arg2: i32) -> (i32, i32) {
    %c0_i32 = arith.constant 0 : i32
    return %arg2, %arg1 : i32, i32
  }
  func.func @transform_2(%arg0: i32, %arg1: i32, %arg2: i32) -> (i32, i32) {
    %c0_i32 = arith.constant 0 : i32
    return %arg0, %arg1 : i32, i32
  }
}

module attributes {stable_mosaic.version = 11 : i64} {
  func.func @_mlp_kernel(%arg0: i32, %arg1: memref<2x10xf32, #tpu.memory_space<vmem>>, %arg2: memref<10x1024xf32, #tpu.memory_space<vmem>>, %arg3: memref<1x1024xf32, #tpu.memory_space<vmem>>, %arg4: memref<1024x512xbf16, #tpu.memory_space<vmem>>, %arg5: memref<1x512xf32, #tpu.memory_space<vmem>>, %arg6: memref<2x512xf32, #tpu.memory_space<vmem>>) attributes {dimension_semantics = [#tpu.dimension_semantics<parallel>], iteration_bounds = array<i64: 4>, scalar_prefetch = 0 : i64, scratch_operands = 0 : i64, tpu.core_type = #tpu.core_type<tc>, window_params = [{pipeline_mode = #tpu.pipeline_mode<synchronous>, transform_indices = @transform_0, window_bounds = array<i64: 2, 10>}, {pipeline_mode = #tpu.pipeline_mode<synchronous>, transform_indices = @transform_1, window_bounds = array<i64: 10, 1024>}, {pipeline_mode = #tpu.pipeline_mode<synchronous>, transform_indices = @transform_2, window_bounds = array<i64: 1, 1024>}, {transform_indices = @transform_3, window_bounds = array<i64: 1024, 512>}, {transform_indices = @transform_4, window_bounds = array<i64: 1, 512>}, {transform_indices = @transform_5, window_bounds = array<i64: 2, 512>}]} {
    %c0 = arith.constant 0 : index
    %c0_0 = arith.constant 0 : index
    %0 = vector.load %arg1[%c0, %c0_0] : memref<2x10xf32, #tpu.memory_space<vmem>>, vector<2x10xf32>
    %c0_1 = arith.constant 0 : index
    %c0_2 = arith.constant 0 : index
    %1 = vector.load %arg2[%c0_1, %c0_2] : memref<10x1024xf32, #tpu.memory_space<vmem>>, vector<10x1024xf32>
    %cst = arith.constant dense<0.000000e+00> : vector<2x1024xf32>
    %2 = tpu.matmul %0, %1, %cst {dimension_numbers = #tpu.dot_dimension_numbers<[1], [0], [0], [1], [0, 0, 1, 1], [], []>} : vector<2x10xf32>, vector<10x1024xf32>, vector<2x1024xf32> -> vector<2x1024xf32>
    %c0_3 = arith.constant 0 : index
    %c0_4 = arith.constant 0 : index
    %3 = vector.load %arg3[%c0_3, %c0_4] : memref<1x1024xf32, #tpu.memory_space<vmem>>, vector<1x1024xf32>
    %4 = vector.broadcast %3 : vector<1x1024xf32> to vector<2x1024xf32>
    %5 = arith.addf %2, %4 : vector<2x1024xf32>
    %cst_5 = arith.constant 0.000000e+00 : f32
    %6 = vector.broadcast %cst_5 : f32 to vector<2x1024xf32>
    %7 = arith.maximumf %5, %6 : vector<2x1024xf32>
    %8 = arith.truncf %7 : vector<2x1024xf32> to vector<2x1024xbf16>
    %c0_6 = arith.constant 0 : index
    %c0_7 = arith.constant 0 : index
    %9 = vector.load %arg4[%c0_6, %c0_7] : memref<1024x512xbf16, #tpu.memory_space<vmem>>, vector<1024x512xbf16>
    %cst_8 = arith.constant dense<0.000000e+00> : vector<2x512xf32>
    %10 = tpu.matmul %8, %9, %cst_8 {dimension_numbers = #tpu.dot_dimension_numbers<[1], [0], [0], [1], [0, 0, 1, 1], [], []>} : vector<2x1024xbf16>, vector<1024x512xbf16>, vector<2x512xf32> -> vector<2x512xf32>
    %c0_9 = arith.constant 0 : index
    %c0_10 = arith.constant 0 : index
    %11 = vector.load %arg5[%c0_9, %c0_10] : memref<1x512xf32, #tpu.memory_space<vmem>>, vector<1x512xf32>
    %12 = vector.broadcast %11 : vector<1x512xf32> to vector<2x512xf32>
    %13 = arith.addf %10, %12 : vector<2x512xf32>
    %cst_11 = arith.constant 0.000000e+00 : f32
    %14 = vector.broadcast %cst_11 : f32 to vector<2x512xf32>
    %15 = arith.maximumf %13, %14 : vector<2x512xf32>
    %c0_12 = arith.constant 0 : index
    %c0_13 = arith.constant 0 : index
    %16 = vector.load %arg6[%c0_12, %c0_13] : memref<2x512xf32, #tpu.memory_space<vmem>>, vector<2x512xf32>
    tpu.vector_store %arg6[%c0_12, %c0_13], %15 {strides = array<i32>} : memref<2x512xf32, #tpu.memory_space<vmem>>, vector<2x512xf32>,
    return
  }
  func.func @transform_0(%arg0: i32) -> (i32, i32) {
    %c0_i32 = arith.constant 0 : i32
    %c0_i32_0 = arith.constant 0 : i32
    %c0_i32_1 = arith.constant 0 : i32
    return %c0_i32, %c0_i32_0 : i32, i32
  }
  func.func @transform_1(%arg0: i32) -> (i32, i32) {
    %c0_i32 = arith.constant 0 : i32
    %c0_i32_0 = arith.constant 0 : i32
    %c0_i32_1 = arith.constant 0 : i32
    return %c0_i32, %c0_i32_0 : i32, i32
  }
  func.func @transform_2(%arg0: i32) -> (i32, i32) {
    %c0_i32 = arith.constant 0 : i32
    %c0_i32_0 = arith.constant 0 : i32
    %c0_i32_1 = arith.constant 0 : i32
    return %c0_i32, %c0_i32_0 : i32, i32
  }
  func.func @transform_3(%arg0: i32) -> (i32, i32) {
    %c0_i32 = arith.constant 0 : i32
    %c0_i32_0 = arith.constant 0 : i32
    return %c0_i32, %arg0 : i32, i32
  }
  func.func @transform_4(%arg0: i32) -> (i32, i32) {
    %c0_i32 = arith.constant 0 : i32
    %c0_i32_0 = arith.constant 0 : i32
    return %c0_i32, %arg0 : i32, i32
  }
  func.func @transform_5(%arg0: i32) -> (i32, i32) {
    %c0_i32 = arith.constant 0 : i32
    %c0_i32_0 = arith.constant 0 : i32
    return %c0_i32, %arg0 : i32, i32
  }
}

module attributes {stable_mosaic.version = 11 : i64} {
  func.func @_matmul_kernel(%arg0: i32, %arg1: i32, %arg2: i32, %arg3: memref<64x64xf32, #tpu.memory_space<vmem>>, %arg4: memref<64x128xbf16, #tpu.memory_space<vmem>>, %arg5: memref<64x128xf32, #tpu.memory_space<vmem>>, %arg6: memref<64x128xf32, #tpu.memory_space<vmem>>) attributes {dimension_semantics = [#tpu.dimension_semantics<parallel>, #tpu.dimension_semantics<parallel>, #tpu.dimension_semantics<arbitrary>], iteration_bounds = array<i64: 2, 1, 1>, scalar_prefetch = 0 : i64, scratch_operands = 1 : i64, tpu.core_type = #tpu.core_type<tc>, window_params = [{transform_indices = @transform_0, window_bounds = array<i64: 64, 64>}, {transform_indices = @transform_1, window_bounds = array<i64: 64, 128>}, {transform_indices = @transform_2, window_bounds = array<i64: 64, 128>}]} {
    %c0_i32 = arith.constant 0 : i32
    %0 = arith.cmpi eq, %arg2, %c0_i32 : i32
    %1 = arith.extui %0 : i1 to i32
    %c0_i32_0 = arith.constant 0 : i32
    %2 = arith.cmpi ne, %1, %c0_i32_0 : i32
    scf.if %2 {
      %cst_10 = arith.constant 0.000000e+00 : f32
      %13 = vector.broadcast %cst_10 : f32 to vector<64x128xf32>
      %c0_11 = arith.constant 0 : index
      %c0_12 = arith.constant 0 : index
      %14 = vector.load %arg6[%c0_11, %c0_12] : memref<64x128xf32, #tpu.memory_space<vmem>>, vector<64x128xf32>
      tpu.vector_store %arg6[%c0_11, %c0_12], %13 {strides = array<i32>} : memref<64x128xf32, #tpu.memory_space<vmem>>, vector<64x128xf32>,
    } else {
    }
    %c0 = arith.constant 0 : index
    %c0_1 = arith.constant 0 : index
    %3 = vector.load %arg6[%c0, %c0_1] : memref<64x128xf32, #tpu.memory_space<vmem>>, vector<64x128xf32>
    %c0_2 = arith.constant 0 : index
    %c0_3 = arith.constant 0 : index
    %4 = vector.load %arg3[%c0_2, %c0_3] : memref<64x64xf32, #tpu.memory_space<vmem>>, vector<64x64xf32>
    %5 = arith.truncf %4 : vector<64x64xf32> to vector<64x64xbf16>
    %c0_4 = arith.constant 0 : index
    %c0_5 = arith.constant 0 : index
    %6 = vector.load %arg4[%c0_4, %c0_5] : memref<64x128xbf16, #tpu.memory_space<vmem>>, vector<64x128xbf16>
    %cst = arith.constant dense<0.000000e+00> : vector<64x128xf32>
    %7 = tpu.matmul %5, %6, %cst {dimension_numbers = #tpu.dot_dimension_numbers<[1], [0], [0], [1], [0, 0, 1, 1], [], []>} : vector<64x64xbf16>, vector<64x128xbf16>, vector<64x128xf32> -> vector<64x128xf32>
    %8 = arith.addf %3, %7 : vector<64x128xf32>
    %c0_6 = arith.constant 0 : index
    %c0_7 = arith.constant 0 : index
    %9 = vector.load %arg6[%c0_6, %c0_7] : memref<64x128xf32, #tpu.memory_space<vmem>>, vector<64x128xf32>
    tpu.vector_store %arg6[%c0_6, %c0_7], %8 {strides = array<i32>} : memref<64x128xf32, #tpu.memory_space<vmem>>, vector<64x128xf32>,
    %c0_i32_8 = arith.constant 0 : i32
    %10 = arith.cmpi eq, %arg2, %c0_i32_8 : i32
    %11 = arith.extui %10 : i1 to i32
    %c0_i32_9 = arith.constant 0 : i32
    %12 = arith.cmpi ne, %11, %c0_i32_9 : i32
    scf.if %12 {
      %c0_10 = arith.constant 0 : index
      %c0_11 = arith.constant 0 : index
      %13 = vector.load %arg6[%c0_10, %c0_11] : memref<64x128xf32, #tpu.memory_space<vmem>>, vector<64x128xf32>
      %c0_12 = arith.constant 0 : index
      %c0_13 = arith.constant 0 : index
      %14 = vector.load %arg5[%c0_12, %c0_13] : memref<64x128xf32, #tpu.memory_space<vmem>>, vector<64x128xf32>
      tpu.vector_store %arg5[%c0_12, %c0_13], %13 {strides = array<i32>} : memref<64x128xf32, #tpu.memory_space<vmem>>, vector<64x128xf32>,
    } else {
    }
    return
  }
  func.func @transform_0(%arg0: i32, %arg1: i32, %arg2: i32) -> (i32, i32) {
    %c0_i32 = arith.constant 0 : i32
    return %arg0, %arg2 : i32, i32
  }
  func.func @transform_1(%arg0: i32, %arg1: i32, %arg2: i32) -> (i32, i32) {
    %c0_i32 = arith.constant 0 : i32
    return %arg2, %arg1 : i32, i32
  }
  func.func @transform_2(%arg0: i32, %arg1: i32, %arg2: i32) -> (i32, i32) {
    %c0_i32 = arith.constant 0 : i32
    return %arg0, %arg1 : i32, i32
  }
}

</mosaic_0001>

<bundles_post_ra>
// kernel: decoder_forward.4
= control target key start
LH: loop header
LB: loop body
LE: loop exit
PB: predicated region body
PF: predicated region fallthrough
CT: control target
= control target key end

     0   :  { %s1038_s9 = smov 0   ;;  %s1040_s10 = smov 0   ;;  %s1266_s0 = inlined_call_operand.vmem [shape: f32[32,128], index: 0, kind: input, shape index: {}]   ;;  %s1267_s1 = inlined_call_operand.vmem [shape: bf16[128,1024], index: 1, kind: input, shape index: {}]   ;;  %s1268_s2 = inlined_call_operand.vmem [shape: f32[32,1024], index: 2, kind: output, shape index: {}]  }
   0x1   :  { %s1042_s11 = smov 0   ;;  %s1044_s12 = smov 0  }
   0x2   :  { %s1046_s13 = smov 0  }
   0x3 LB: > { %s27_s14 = sadd.s32 1, %s1016_s12  ;;  %s843_s15 = sadd.s32 4294967295, %s1020_s13   ;;  %s1020_s13 = sphi %s1046_s13, %s12_s13   ;;  %s1016_s12 = sphi %s1044_s12, %s1273_s12   ;;  %s1012_s11 = sphi %s1042_s11, %s1272_s11   ;;  %s1008_s10 = sphi %s1040_s10, %s1271_s10   ;;  %s1004_s9 = sphi %s1038_s9, %s1270_s9  }
   0x4   : > { %p29_p0 = scmp.ge.s32.totalorder %s27_s14, 2  ;;  %p75_p1 = scmp.ne.s32.totalorder %s1008_s10, %s1004_s9 }
   0x5   : > { %p76_p2 = scmp.eq.s32.totalorder %s1020_s13, 0  ;;  %p107_p4 = scmp.eq.s32.totalorder %s843_s15, 1 }
   0x6   : > { %s1275_s14 = smov (%p29_p0, %s27_s14), 0  ;;  %s68_s17 = sadd.s32 1, %s1008_s10 }
   0x7   : > { %p77_p3 = por %p76_p2, %p75_p1  ;;  %s64_s16 = ssub.s32 %s1016_s12, %s1275_s14 }
   0x8   : > { %p66_p5 = scmp.eq.s32.totalorder %s64_s16, 0  ;;  %p1073_p6 = por %p107_p4, %p75_p1 }
   0x9   : > { %p847_p7 = scmp.ge.s32.totalorder %s1020_s13, 2 }
   0xa   : > { %s1078_s19 = scalar_select %p66_p5, %s1008_s10, %s68_s17  }
   0xb   : > { %141 = sbr.rel (%p847_p7) target bundleno = 38 (0x26), region = 20 }
  0x12   : > { %144 = sbr.rel (!%p77_p3) target bundleno = 38 (0x26), region = 24  ;;  %s146_s20 = sand.u32 (%p77_p3), 1, %s1008_s10  }
  0x13   : > { %s891_s21 = sshll.u32 (%p77_p3), %s1016_s12, 4  ;;  %s848_s22 = sshll.u32 (%p77_p3), %s146_s20, 8 }
  0x14   : > { %s1086_s25 = scalar_lea.vmem (%p77_p3), %s1267_s1, %s891_s21  ;;  %s1091_s26 = scalar_lea.vmem (%p77_p3), [#allocation3], %s848_s22 }
  0x15   : > { %v167_v0 = vld [vmem:[%s1086_s25] sm:$0xff] (%p77_p3)  ;;  %v169_v1 = vld [vmem:[%s1086_s25 + $0x8] sm:$0xff] (%p77_p3) }
  0x16   : > { %v171_v2 = vld [vmem:[%s1086_s25 + $0x20] sm:$0xff] (%p77_p3)  ;;  %168 = vst [vmem:[%s1091_s26] sm:$0xff] (%p77_p3), %v167_v0  ;;  %170 = vst [vmem:[%s1091_s26 + $0x8] sm:$0xff] (%p77_p3), %v169_v1  ;;  %v173_v3 = vld [vmem:[%s1086_s25 + $0x28] sm:$0xff] (%p77_p3) }
  0x17   : > { %172 = vst [vmem:[%s1091_s26 + $0x10] sm:$0xff] (%p77_p3), %v171_v2  ;;  %v175_v4 = vld [vmem:[%s1086_s25 + $0x40] sm:$0xff] (%p77_p3)  ;;  %v177_v5 = vld [vmem:[%s1086_s25 + $0x48] sm:$0xff] (%p77_p3)  ;;  %174 = vst [vmem:[%s1091_s26 + $0x18] sm:$0xff] (%p77_p3), %v173_v3 }
  0x18   : > { %176 = vst [vmem:[%s1091_s26 + $0x20] sm:$0xff] (%p77_p3), %v175_v4  ;;  %178 = vst [vmem:[%s1091_s26 + $0x28] sm:$0xff] (%p77_p3), %v177_v5  ;;  %v179_v6 = vld [vmem:[%s1086_s25 + $0x60] sm:$0xff] (%p77_p3)  ;;  %v181_v7 = vld [vmem:[%s1086_s25 + $0x68] sm:$0xff] (%p77_p3) }
  0x19   : > { %v183_v8 = vld [vmem:[%s1086_s25 + $0x80] sm:$0xff]  ;;  %180 = vst [vmem:[%s1091_s26 + $0x30] sm:$0xff] %v179_v6  ;;  %182 = vst [vmem:[%s1091_s26 + $0x38] sm:$0xff] %v181_v7  ;;  %v185_v9 = vld [vmem:[%s1086_s25 + $0x88] sm:$0xff] }
  0x1a   : > { %184 = vst [vmem:[%s1091_s26 + $0x40] sm:$0xff] %v183_v8  ;;  %v187_v10 = vld [vmem:[%s1086_s25 + $0xa0] sm:$0xff]  ;;  %v189_v11 = vld [vmem:[%s1086_s25 + $0xa8] sm:$0xff]  ;;  %186 = vst [vmem:[%s1091_s26 + $0x48] sm:$0xff] %v185_v9 }
  0x1b   : > { %188 = vst [vmem:[%s1091_s26 + $0x50] sm:$0xff] %v187_v10  ;;  %190 = vst [vmem:[%s1091_s26 + $0x58] sm:$0xff] %v189_v11  ;;  %v191_v12 = vld [vmem:[%s1086_s25 + $0xc0] sm:$0xff]  ;;  %v193_v13 = vld [vmem:[%s1086_s25 + $0xc8] sm:$0xff] }
  0x1c   : > { %v195_v14 = vld [vmem:[%s1086_s25 + $0xe0] sm:$0xff]  ;;  %192 = vst [vmem:[%s1091_s26 + $0x60] sm:$0xff] %v191_v12  ;;  %194 = vst [vmem:[%s1091_s26 + $0x68] sm:$0xff] %v193_v13  ;;  %v197_v15 = vld [vmem:[%s1086_s25 + $0xe8] sm:$0xff] }
  0x1d   : > { %196 = vst [vmem:[%s1091_s26 + $0x70] sm:$0xff] %v195_v14  ;;  %v199_v16 = vld [vmem:[%s1086_s25 + $0x100] sm:$0xff]  ;;  %v201_v17 = vld [vmem:[%s1086_s25 + $0x108] sm:$0xff]  ;;  %198 = vst [vmem:[%s1091_s26 + $0x78] sm:$0xff] %v197_v15 }
  0x1e   : > { %200 = vst [vmem:[%s1091_s26 + $0x80] sm:$0xff] %v199_v16  ;;  %202 = vst [vmem:[%s1091_s26 + $0x88] sm:$0xff] %v201_v17  ;;  %v203_v18 = vld [vmem:[%s1086_s25 + $0x120] sm:$0xff]  ;;  %v205_v19 = vld [vmem:[%s1086_s25 + $0x128] sm:$0xff] }
  0x1f   : > { %v207_v20 = vld [vmem:[%s1086_s25 + $0x140] sm:$0xff]  ;;  %204 = vst [vmem:[%s1091_s26 + $0x90] sm:$0xff] %v203_v18  ;;  %206 = vst [vmem:[%s1091_s26 + $0x98] sm:$0xff] %v205_v19  ;;  %v209_v21 = vld [vmem:[%s1086_s25 + $0x148] sm:$0xff] }
  0x20   : > { %208 = vst [vmem:[%s1091_s26 + $0xa0] sm:$0xff] %v207_v20  ;;  %v211_v22 = vld [vmem:[%s1086_s25 + $0x160] sm:$0xff]  ;;  %v213_v23 = vld [vmem:[%s1086_s25 + $0x168] sm:$0xff]  ;;  %210 = vst [vmem:[%s1091_s26 + $0xa8] sm:$0xff] %v209_v21 }
  0x21   : > { %212 = vst [vmem:[%s1091_s26 + $0xb0] sm:$0xff] %v211_v22  ;;  %214 = vst [vmem:[%s1091_s26 + $0xb8] sm:$0xff] %v213_v23  ;;  %v215_v24 = vld [vmem:[%s1086_s25 + $0x180] sm:$0xff]  ;;  %v217_v25 = vld [vmem:[%s1086_s25 + $0x188] sm:$0xff] }
  0x22   : > { %v219_v26 = vld [vmem:[%s1086_s25 + $0x1a0] sm:$0xff]  ;;  %216 = vst [vmem:[%s1091_s26 + $0xc0] sm:$0xff] %v215_v24  ;;  %218 = vst [vmem:[%s1091_s26 + $0xc8] sm:$0xff] %v217_v25  ;;  %v221_v27 = vld [vmem:[%s1086_s25 + $0x1a8] sm:$0xff] }
  0x23   : > { %220 = vst [vmem:[%s1091_s26 + $0xd0] sm:$0xff] %v219_v26  ;;  %v223_v28 = vld [vmem:[%s1086_s25 + $0x1c0] sm:$0xff]  ;;  %v225_v29 = vld [vmem:[%s1086_s25 + $0x1c8] sm:$0xff]  ;;  %222 = vst [vmem:[%s1091_s26 + $0xd8] sm:$0xff] %v221_v27 }
  0x24   : > { %224 = vst [vmem:[%s1091_s26 + $0xe0] sm:$0xff] %v223_v28  ;;  %226 = vst [vmem:[%s1091_s26 + $0xe8] sm:$0xff] %v225_v29  ;;  %v227_v30 = vld [vmem:[%s1086_s25 + $0x1e0] sm:$0xff]  ;;  %v229_v31 = vld [vmem:[%s1086_s25 + $0x1e8] sm:$0xff] }
  0x25   : > { %228 = vst [vmem:[%s1091_s26 + $0xf0] sm:$0xff] %v227_v30  ;;  %230 = vst [vmem:[%s1091_s26 + $0xf8] sm:$0xff] %v229_v31 }
  0x26 PF: > { %p851_p8 = scmp.ge.s32.totalorder %s1020_s13, 1  ;;  %p235_p9 = scmp.lt.s32.totalorder %s1020_s13, 3 }
  0x28   : > { %p236_p10 = pnand %p851_p8, %p235_p9 }
  0x29   : > { %s242_s27 = sand.u32 (!%p236_p10), 1, %s1004_s9   ;;  %v1022_v32 = vmov (!%p236_p10), 0   ;;  %v320_v63 = vld [vmem:[%s1266_s0] sm:$0xff] (!%p236_p10)  ;;  %v321_v2 = vld [vmem:[%s1266_s0 + $0x8] sm:$0xff] (!%p236_p10)  ;;  %v322_v4 = vld [vmem:[%s1266_s0 + $0x10] sm:$0xff] (!%p236_p10) }
  0x2a   : > { %239 = sbr.rel (%p236_p10) target bundleno = 309 (0x135), region = 47  ;;  %s852_s28 = sshll.u32 (!%p236_p10), %s242_s27, 8  ;;  %550 = vmatprep.mubr.bf16.mxu0 (!%p236_p10), %v1022_v32  ;;  %603 = vmatprep.mubr.bf16.mxu1 (!%p236_p10), %v1022_v32  ;;  %v324_v3 = vpack.c.bf16 (!%p236_p10), %v321_v2, %v320_v63  ;;  %v323_v5 = vld [vmem:[%s1266_s0 + $0x18] sm:$0xff] (!%p236_p10) }
  0x2b   : > { %s1161_s29 = scalar_lea.vmem (!%p236_p10), [#allocation3], %s852_s28  ;;  %v325_v6 = vpack.c.bf16 (!%p236_p10), %v323_v5, %v322_v4  ;;  %s853_s16 = sshll.u32 (!%p236_p10), %s242_s27, 7 }
  0x2c   : > { %v934_v33 = vld [vmem:[%s1161_s29 + $0x4] ss:$16 sps:$4 sm:$0xff] (!%p236_p10)   ;;  %v936_v34 = vld [vmem:[%s1161_s29 + $0xc] ss:$16 sps:$4 sm:$0xff] (!%p236_p10)   ;;  %v938_v35 = vld [vmem:[%s1161_s29] ss:$16 sps:$4 sm:$0xff] (!%p236_p10)  }
  0x2d   : > { %518 = vmatprep.subr.bf16.mxu0 (!%p236_p10), %v934_v33  ;;  %v939_v36 = vld [vmem:[%s1161_s29 + $0x8] ss:$16 sps:$4 sm:$0xff] (!%p236_p10)   ;;  %571 = vmatprep.subr.bf16.mxu1 (!%p236_p10), %v936_v34  ;;  %v940_v37 = vld [vmem:[%s1161_s29 + $0x24] ss:$16 sps:$4 sm:$0xff] (!%p236_p10)   ;;  %v942_v38 = vld [vmem:[%s1161_s29 + $0x2c] ss:$16 sps:$4 sm:$0xff] (!%p236_p10)  }
  0x2e   : > { %519 = vmatpush1.bf16.msra.mxu0 (!%p236_p10), %v938_v35  ;;  %572 = vmatpush1.bf16.msra.mxu1 (!%p236_p10), %v939_v36  ;;  %v944_v39 = vld [vmem:[%s1161_s29 + $0x20] ss:$16 sps:$4 sm:$0xff] (!%p236_p10)   ;;  %v945_v40 = vld [vmem:[%s1161_s29 + $0x28] ss:$16 sps:$4 sm:$0xff] (!%p236_p10)   ;;  %v946_v41 = vld [vmem:[%s1161_s29 + $0x44] ss:$16 sps:$4 sm:$0xff] (!%p236_p10)  }
  0x2f   : > { %520 = vmatprep.subr.bf16.mxu0 (!%p236_p10), %v940_v37  ;;  %573 = vmatprep.subr.bf16.mxu1 (!%p236_p10), %v942_v38  ;;  %v948_v42 = vld [vmem:[%s1161_s29 + $0x4c] ss:$16 sps:$4 sm:$0xff] (!%p236_p10)   ;;  %v950_v43 = vld [vmem:[%s1161_s29 + $0x40] ss:$16 sps:$4 sm:$0xff] (!%p236_p10)   ;;  %v951_v44 = vld [vmem:[%s1161_s29 + $0x48] ss:$16 sps:$4 sm:$0xff] (!%p236_p10)  }
  0x30   : > { %v952_v45 = vld [vmem:[%s1161_s29 + $0x64] ss:$16 sps:$4 sm:$0xff] (!%p236_p10)   ;;  %v954_v46 = vld [vmem:[%s1161_s29 + $0x6c] ss:$16 sps:$4 sm:$0xff] (!%p236_p10)   ;;  %v956_v47 = vld [vmem:[%s1161_s29 + $0x60] ss:$16 sps:$4 sm:$0xff] (!%p236_p10)  }
  0x31   : > { %v957_v48 = vld [vmem:[%s1161_s29 + $0x68] ss:$16 sps:$4 sm:$0xff]   ;;  %v958_v49 = vld [vmem:[%s1161_s29 + $0x84] ss:$16 sps:$4 sm:$0xff]   ;;  %v960_v50 = vld [vmem:[%s1161_s29 + $0x8c] ss:$16 sps:$4 sm:$0xff]  }
  0x32   : > { %521 = vmatpush1.bf16.msra.mxu0 %v944_v39  ;;  %574 = vmatpush1.bf16.msra.mxu1 %v945_v40  ;;  %v962_v51 = vld [vmem:[%s1161_s29 + $0x80] ss:$16 sps:$4 sm:$0xff]   ;;  %v963_v52 = vld [vmem:[%s1161_s29 + $0x88] ss:$16 sps:$4 sm:$0xff]   ;;  %v964_v53 = vld [vmem:[%s1161_s29 + $0xa4] ss:$16 sps:$4 sm:$0xff]  }
  0x33   : > { %522 = vmatprep.subr.bf16.mxu0 %v946_v41  ;;  %575 = vmatprep.subr.bf16.mxu1 %v948_v42  ;;  %v966_v54 = vld [vmem:[%s1161_s29 + $0xac] ss:$16 sps:$4 sm:$0xff]   ;;  %v968_v55 = vld [vmem:[%s1161_s29 + $0xa0] ss:$16 sps:$4 sm:$0xff]   ;;  %v969_v56 = vld [vmem:[%s1161_s29 + $0xa8] ss:$16 sps:$4 sm:$0xff]  }
  0x34   : > { %v970_v57 = vld [vmem:[%s1161_s29 + $0xc4] ss:$16 sps:$4 sm:$0xff]   ;;  %v972_v58 = vld [vmem:[%s1161_s29 + $0xcc] ss:$16 sps:$4 sm:$0xff]   ;;  %v974_v59 = vld [vmem:[%s1161_s29 + $0xc0] ss:$16 sps:$4 sm:$0xff]  }
  0x35   : > { %v975_v60 = vld [vmem:[%s1161_s29 + $0xc8] ss:$16 sps:$4 sm:$0xff]   ;;  %v976_v61 = vld [vmem:[%s1161_s29 + $0xe4] ss:$16 sps:$4 sm:$0xff]   ;;  %v978_v62 = vld [vmem:[%s1161_s29 + $0xec] ss:$16 sps:$4 sm:$0xff]  }
  0x36   : > { %523 = vmatpush1.bf16.msra.mxu0 %v950_v43  ;;  %576 = vmatpush1.bf16.msra.mxu1 %v951_v44  ;;  %v980_v0 = vld [vmem:[%s1161_s29 + $0xe0] ss:$16 sps:$4 sm:$0xff]   ;;  %v981_v1 = vld [vmem:[%s1161_s29 + $0xe8] ss:$16 sps:$4 sm:$0xff]   ;;  %s1211_s17 = scalar_lea.vmem [#allocation4], %s853_s16  ;;  %s892_s9 = sshll.u32 (%p1073_p6), %s1012_s11, 5 }
  0x37   : > { %524 = vmatprep.subr.bf16.mxu0 %v952_v45  ;;  %577 = vmatprep.subr.bf16.mxu1 %v954_v46  ;;  %s703_s22 = scalar_lea.vmem (%p1073_p6), %s1268_s2, %s892_s9 }
  0x3a   : > { %525 = vmatpush1.bf16.msra.mxu0 %v956_v47  ;;  %578 = vmatpush1.bf16.msra.mxu1 %v957_v48 }
  0x3b   : > { %526 = vmatprep.subr.bf16.mxu0 %v958_v49  ;;  %579 = vmatprep.subr.bf16.mxu1 %v960_v50 }
  0x3e   : > { %527 = vmatpush1.bf16.msra.mxu0 %v962_v51  ;;  %580 = vmatpush1.bf16.msra.mxu1 %v963_v52 }
  0x3f   : > { %528 = vmatprep.subr.bf16.mxu0 %v964_v53  ;;  %581 = vmatprep.subr.bf16.mxu1 %v966_v54 }
  0x42   : > { %529 = vmatpush1.bf16.msra.mxu0 %v968_v55  ;;  %582 = vmatpush1.bf16.msra.mxu1 %v969_v56 }
  0x43   : > { %530 = vmatprep.subr.bf16.mxu0 %v970_v57  ;;  %583 = vmatprep.subr.bf16.mxu1 %v972_v58 }
  0x46   : > { %531 = vmatpush1.bf16.msra.mxu0 %v974_v59  ;;  %584 = vmatpush1.bf16.msra.mxu1 %v975_v60 }
  0x47   : > { %532 = vmatprep.subr.bf16.mxu0 %v976_v61  ;;  %585 = vmatprep.subr.bf16.mxu1 %v978_v62 }
  0x4a   : > { %533 = vmatpush1.bf16.msra.mxu0 %v980_v0  ;;  %586 = vmatpush1.bf16.msra.mxu1 %v981_v1 }
  0x4d   : > { %551 = vmatmul.mubr.bf16.vlgmr.msra.gmra.mrb[0].mxu0 %v324_v3  ;;  %604 = vmatmul.mubr.bf16.vlgmr.msra.gmra.mrb[0].mxu1 %v324_v3 }
  0x4e   : > { %560 = vmatprep.mubr.bf16.mxu0 %v1022_v32  ;;  %613 = vmatprep.mubr.bf16.mxu1 %v1022_v32 }
  0x55   : > { %561 = vmatmul.mubr.bf16.gmra.mrb[4].mxu0 %v325_v6  ;;  %614 = vmatmul.mubr.bf16.gmra.mrb[4].mxu1 %v325_v6 }
 0x120   : > { %v552_v7 = vpop.f32.mrb[0].mxu0  ;;  %v605_v8 = vpop.f32.mrb[0].mxu1 }
 0x121   : > { %675 = vst [vmem:[%s1211_s17] sm:$0xff] %v552_v7  ;;  %677 = vst [vmem:[%s1211_s17 + $0x10] sm:$0xff] %v605_v8  ;;  %v554_v9 = vpop.f32.mrb[1].mxu0  ;;  %v607_v10 = vpop.f32.mrb[1].mxu1 }
 0x122   : > { %676 = vst [vmem:[%s1211_s17 + $0x8] sm:$0xff] %v554_v9  ;;  %678 = vst [vmem:[%s1211_s17 + $0x18] sm:$0xff] %v607_v10  ;;  %v556_v11 = vpop.f32.mrb[2].mxu0  ;;  %v609_v12 = vpop.f32.mrb[2].mxu1 }
 0x123   : > { %679 = vst [vmem:[%s1211_s17 + $0x20] sm:$0xff] %v556_v11  ;;  %681 = vst [vmem:[%s1211_s17 + $0x30] sm:$0xff] %v609_v12  ;;  %v558_v13 = vpop.f32.mrb[3].mxu0  ;;  %v611_v14 = vpop.f32.mrb[3].mxu1 }
 0x124   : > { %680 = vst [vmem:[%s1211_s17 + $0x28] sm:$0xff] %v558_v13  ;;  %682 = vst [vmem:[%s1211_s17 + $0x38] sm:$0xff] %v611_v14 }
 0x126   : > { %697 = sbr.rel (!%p1073_p6) target bundleno = 309 (0x135), region = 63 }
 0x128   : > { %v562_v15 = vpop.f32.mrb[4].mxu0  ;;  %v615_v16 = vpop.f32.mrb[4].mxu1  ;;  %v716_v23 = vld [vmem:[%s1211_s17] sm:$0xff] (%p1073_p6)  ;;  %v720_v25 = vld [vmem:[%s1211_s17 + $0x10] sm:$0xff] (%p1073_p6) }
 0x129   : > { %683 = vst [vmem:[%s1211_s17 + $0x40] sm:$0xff] %v562_v15  ;;  %685 = vst [vmem:[%s1211_s17 + $0x50] sm:$0xff] %v615_v16  ;;  %v564_v17 = vpop.f32.mrb[5].mxu0  ;;  %v617_v18 = vpop.f32.mrb[5].mxu1  ;;  %v718_v24 = vld [vmem:[%s1211_s17 + $0x8] sm:$0xff] (%p1073_p6)  ;;  %v722_v26 = vld [vmem:[%s1211_s17 + $0x18] sm:$0xff] (%p1073_p6) }
 0x12a   : > { %684 = vst [vmem:[%s1211_s17 + $0x48] sm:$0xff] %v564_v17  ;;  %686 = vst [vmem:[%s1211_s17 + $0x58] sm:$0xff] %v617_v18  ;;  %v566_v19 = vpop.f32.mrb[6].mxu0  ;;  %v619_v20 = vpop.f32.mrb[6].mxu1  ;;  %v724_v27 = vld [vmem:[%s1211_s17 + $0x20] sm:$0xff] (%p1073_p6)  ;;  %v728_v29 = vld [vmem:[%s1211_s17 + $0x30] sm:$0xff] (%p1073_p6) }
 0x12b   : > { %687 = vst [vmem:[%s1211_s17 + $0x60] sm:$0xff] %v566_v19  ;;  %689 = vst [vmem:[%s1211_s17 + $0x70] sm:$0xff] %v619_v20  ;;  %v568_v21 = vpop.f32.mrb[7].mxu0  ;;  %v621_v22 = vpop.f32.mrb[7].mxu1  ;;  %v726_v28 = vld [vmem:[%s1211_s17 + $0x28] sm:$0xff] (%p1073_p6)  ;;  %v730_v30 = vld [vmem:[%s1211_s17 + $0x38] sm:$0xff] (%p1073_p6) }
 0x12c   : > { %688 = vst [vmem:[%s1211_s17 + $0x68] sm:$0xff] %v568_v21  ;;  %690 = vst [vmem:[%s1211_s17 + $0x78] sm:$0xff] %v621_v22 }
 0x12d   : > { %717 = vst [vmem:[%s703_s22] sm:$0xff] %v716_v23  ;;  %719 = vst [vmem:[%s703_s22 + $0x8] sm:$0xff] %v718_v24 }
 0x12e   : > { %721 = vst [vmem:[%s703_s22 + $0x10] sm:$0xff] %v720_v25  ;;  %723 = vst [vmem:[%s703_s22 + $0x18] sm:$0xff] %v722_v26 }
 0x12f   : > { %725 = vst [vmem:[%s703_s22 + $0x40] sm:$0xff] %v724_v27  ;;  %727 = vst [vmem:[%s703_s22 + $0x48] sm:$0xff] %v726_v28 }
 0x130   : > { %v732_v31 = vld [vmem:[%s1211_s17 + $0x40] sm:$0xff]  ;;  %729 = vst [vmem:[%s703_s22 + $0x50] sm:$0xff] %v728_v29  ;;  %731 = vst [vmem:[%s703_s22 + $0x58] sm:$0xff] %v730_v30  ;;  %v736_v33 = vld [vmem:[%s1211_s17 + $0x50] sm:$0xff] }
 0x131   : > { %733 = vst [vmem:[%s703_s22 + $0x80] sm:$0xff] %v732_v31  ;;  %v734_v32 = vld [vmem:[%s1211_s17 + $0x48] sm:$0xff]  ;;  %v738_v34 = vld [vmem:[%s1211_s17 + $0x58] sm:$0xff]  ;;  %737 = vst [vmem:[%s703_s22 + $0x90] sm:$0xff] %v736_v33 }
 0x132   : > { %735 = vst [vmem:[%s703_s22 + $0x88] sm:$0xff] %v734_v32  ;;  %739 = vst [vmem:[%s703_s22 + $0x98] sm:$0xff] %v738_v34  ;;  %v740_v35 = vld [vmem:[%s1211_s17 + $0x60] sm:$0xff]  ;;  %v744_v37 = vld [vmem:[%s1211_s17 + $0x70] sm:$0xff] }
 0x133   : > { %v742_v36 = vld [vmem:[%s1211_s17 + $0x68] sm:$0xff]  ;;  %741 = vst [vmem:[%s703_s22 + $0xc0] sm:$0xff] %v740_v35  ;;  %745 = vst [vmem:[%s703_s22 + $0xd0] sm:$0xff] %v744_v37  ;;  %v746_v38 = vld [vmem:[%s1211_s17 + $0x78] sm:$0xff] }
 0x134   : > { %743 = vst [vmem:[%s703_s22 + $0xc8] sm:$0xff] %v742_v36  ;;  %747 = vst [vmem:[%s703_s22 + $0xd8] sm:$0xff] %v746_v38 }
 0x135 PF: > { %s12_s13 = sadd.s32 1, %s1020_s13   ;;  %s1270_s9 = smov %s1008_s10 }
 0x136   : > { %p9_p11 = scmp.ge.s32.totalorder %s12_s13, 4   ;;  %s1271_s10 = smov %s1078_s19 }
 0x137   : > { %s1272_s11 = smov %s1016_s12  ;;  %s1273_s12 = smov %s1275_s14 }
 0x138   :  { %11 = sbr.rel (!%p9_p11) target bundleno = 3 (0x3), region = 120 }

// kernel: decoder_forward.3
= control target key start
LH: loop header
LB: loop body
LE: loop exit
PB: predicated region body
PF: predicated region fallthrough
CT: control target
= control target key end

     0   :  { %s4358_s0 = inlined_call_operand.hbm [shape: f32[2,10], index: 0, kind: input, shape index: {}]   ;;  %s4359_s1 = inlined_call_operand.hbm [shape: f32[10,1024], index: 1, kind: input, shape index: {}]   ;;  %s4360_s2 = inlined_call_operand.hbm [shape: f32[1,1024], index: 2, kind: input, shape index: {}]   ;;  %s4361_s3 = inlined_call_operand.hbm [shape: bf16[1024,2048], index: 3, kind: input, shape index: {}]   ;;  %s4362_s4 = inlined_call_operand.hbm [shape: f32[1,2048], index: 4, kind: input, shape index: {}]   ;;  %s4363_s5 = inlined_call_operand.vmem [shape: f32[2,2048], index: 5, kind: output, shape index: {}]  }
   0x1   :  { %4372 = sst [smem:[#allocation14_spill]] %s4359_s1 }
   0x2   :  { %10 = vsyncpa [#allocation3], 0 }
   0x3   :  { %11 = vsyncpa [#allocation5], 0 }
   0x4   :  { %12 = vsyncpa [#allocation8], 0 }
   0x5   :  { %14 = vsyncpa [#allocation8 + $0x1], 0  ;;  %s3783_s18 = smov 0   ;;  %s3785_s19 = smov 0  }
   0x6   :  { %s3787_s20 = smov 0   ;;  %s3789_s21 = smov 0  }
   0x7 LB: > { %s3802_s22 = sadd.s32 4294967295, %s3739_s21   ;;  %s3805_s23 = sadd.s32 1, %s3739_s21   ;;  %s3739_s21 = sphi %s3789_s21, %s4398_s21   ;;  %s3735_s20 = sphi %s3787_s20, %s4397_s20   ;;  %s3731_s19 = sphi %s3785_s19, %s4396_s19   ;;  %s3727_s18 = sphi %s3783_s18, %s4395_s18  }
   0x8   : > { %s87_s24 = ssub.s32 %s3739_s21, %s3805_s23  ;;  %s90_s25 = sadd.s32 1, %s3735_s20 }
   0x9   : > { %p88_p0 = scmp.eq.s32.totalorder %s87_s24, 0  ;;  %p97_p1 = scmp.ne.s32.totalorder %s3735_s20, %s3731_s19 }
   0xa   : > { %p98_p2 = scmp.eq.s32.totalorder %s3739_s21, 0  ;;  %p103_p3 = scmp.ne.s32.totalorder %s3731_s19, %s3727_s18 }
   0xb   : > { %s3815_s26 = scalar_select %p88_p0, %s3735_s20, %s90_s25  }
   0xc   : > { %p3817_p4 = por %p98_p2, %p97_p1  ;;  %p4364_p5 = scmp.eq.s32.totalorder %s3802_s22, 0 }
   0xd   : > { %4373 = sst [smem:[#allocation13_spill]] %s3815_s26  ;;  %p2744_p6 = scmp.ge.s32.totalorder %s3739_s21, 1 }
   0xe   : > { %p166_p7 = scmp.lt.s32.totalorder %s3739_s21, 5  ;;  %p3826_p8 = por %p4364_p5, %p103_p3 }
   0xf   : > { %s3741_s30 = smov [#allocation4]   ;;  %p3123_p12 = scmp.lt.s32.totalorder %s3739_s21, 4 }
  0x10   : > { %s4375_s28 = scalar_select %p3826_p8, 1, 0 }
  0x11   : > { %p3830_p9 = pnand %p2744_p6, %p166_p7  ;;  %s189_s6 = sshll.u32 %s3741_s30, 4  ;;  %s190_s6 = int_to_ptr.vmem [resolvable:$true] %s189_s6 }
  0x12   : > { %s214_s8 = sand.u32 1, %s3739_s21   ;;  %s4370_s9 = sand.u32 1, %s3735_s20  }
  0x13   : > { %s4376_s29 = scalar_select %p3830_p9, 1, 0 }
  0x14   : > { %p3103_p10 = pneg %p3830_p9  ;;  %p3847_p13 = pnand %p3123_p12, %p3817_p4 }
  0x15   : > { %s4379_s1 = sld [smem:[#allocation14_spill]] }
  0x16   : > { %p3838_p11 = pnand %p3103_p10, %p4364_p5 }
  0x17   : > { %s4378_s10 = scalar_select %p3847_p13, 1, 0 }
  0x18   : > { %s4377_s7 = scalar_select %p3838_p11, 1, 0 }
  0x19   : > { %p3859_p1 = pneg %p3838_p11 }
  0x1b   : > { %s3553_s13 = scalar_lea.hbm %s4379_s1, 2048 }
  0x1c   : > { %p3554_p0 = scmp.ne.s32.totalorder %s4379_s1, %s3553_s13  ;;  %p3560_p4 = scmp.lt.u32.totalorder %s3553_s13, %s4379_s1 }
  0x1e   : > { %p3556_p2 = pnand %p3859_p1, %p3554_p0 }
  0x20   : > { %p3557_p3 = pneg %p3556_p2 }
  0x22   : > { %p3562_p6 = pnand %p3560_p4, %p3557_p3 }
  0x24   : > { %3565 = shalt.err (!%p3562_p6)
}
  0x25   : > { %s3566_s24 = scalar_lea.vmem %s190_s6, 2048  ;;  %p3574_p5 = scmp.lt.s32.totalorder %s190_s6, %s190_s6 }
  0x26   : > { %p3567_p7 = scmp.ne.s32.totalorder %s190_s6, %s3566_s24  ;;  %p3575_p8 = scmp.lt.s32.totalorder %s3566_s24, %s3566_s24 }
  0x28   : > { %p3569_p10 = pnand %p3567_p7, %p3859_p1  ;;  %p3576_p9 = por %p3575_p8, %p3574_p5 }
  0x2a   : > { %p3570_p12 = pneg %p3569_p10 }
  0x2c   : > { %p3577_p13 = pnand %p3576_p9, %p3570_p12 }
  0x2e   : > { %3580 = shalt.err (!%p3577_p13)
}
  0x2f   : > { %s3742_s25 = smov 1024   ;;  %s3743_s27 = smov 64  }
  0x30   : > { %3109 = dma.hbm_to_vmem [thread:$0]  (!%p3838_p11), %s4379_s1, 2048, %s190_s6, [#allocation5], %s3742_s25, %s3742_s25, %s3743_s27  }
  0x31   : > { %s2749_s12 = sshll.u32 %s4370_s9, 11  ;;  %s3033_s13 = sshll.u32 %s3739_s21, 8 }
  0x32   : > { %s3883_s17 = scalar_lea.hbm %s4361_s3, %s3033_s13  ;;  %s218_s18 = scalar_lea.vmem [#allocation7], %s2749_s12 }
  0x33   : > { %s225_s24 = sshll.u32 %s218_s18, 4  ;;  %s3887_s26 = scalar_lea.sflag [#allocation8], %s214_s8  ;;  %s3885_s24 = int_to_ptr.vmem [resolvable:$true] %s225_s24 }
  0x34   : > { %s3581_s30 = scalar_lea.hbm %s3883_s17, 32768  ;;  %p4381_p8 = scmp.ne.s32.totalorder %s4378_s10, 0 }
  0x35   : > { %p3582_p5 = scmp.ne.s32.totalorder %s3883_s17, %s3581_s30  ;;  %s3586_s11 = scalar_lea.hbm %s4361_s3, 131072 }
  0x36   : > { %p4371_p9 = pneg %p4381_p8  ;;  %p3587_p2 = scmp.lt.u32.totalorder %s3883_s17, %s4361_s3 }
  0x37   : > { %p3588_p3 = scmp.lt.u32.totalorder %s3586_s11, %s3581_s30  ;;  %p3590_p6 = scmp.lt.u32.totalorder %s3581_s30, %s3883_s17 }
  0x38   : > { %p3584_p13 = pnand %p4371_p9, %p3582_p5 }
  0x39   : > { %p3589_p4 = por %p3588_p3, %p3587_p2 }
  0x3a   : > { %p3585_p0 = pneg %p3584_p13 }
  0x3b   : > { %p3591_p7 = por %p3590_p6, %p3589_p4 }
  0x3d   : > { %p3592_p10 = pnand %p3591_p7, %p3585_p0 }
  0x3f   : > { %3595 = shalt.err (!%p3592_p10)
}
  0x40   : > { %s3596_s8 = scalar_lea.vmem %s3885_s24, 32768  ;;  %s3744_s12 = smov [#allocation7]  }
  0x41   : > { %p3597_p12 = scmp.ne.s32.totalorder %s3885_s24, %s3596_s8  ;;  %s3601_s15 = sshll.u32 %s3744_s12, 4  ;;  %s3602_s15 = int_to_ptr.vmem [resolvable:$false] %s3601_s15 }
  0x42   : > { %s3603_s18 = scalar_lea.vmem %s3602_s15, 65536  ;;  %p3604_p11 = scmp.lt.s32.totalorder %s3885_s24, %s3602_s15 }
  0x43   : > { %p3599_p5 = pnand %p3597_p12, %p4371_p9  ;;  %p3605_p2 = scmp.lt.s32.totalorder %s3603_s18, %s3596_s8 }
  0x45   : > { %p3600_p13 = pneg %p3599_p5  ;;  %p3606_p3 = por %p3605_p2, %p3604_p11 }
  0x47   : > { %p3607_p4 = pnand %p3606_p3, %p3600_p13 }
  0x49   : > { %3610 = shalt.err (!%p3607_p4)
}
  0x4a   : > { %s3745_s30 = smov 256   ;;  %s3746_s6 = smov 16  }
  0x4b   : > { %3116 = dma.hbm_to_vmem [thread:$0]  (!%p4381_p8), %s3883_s17, 32768, %s3885_s24, %s3887_s26, %s3742_s25, %s3745_s30, %s3746_s6  }
  0x4c   : > { %s3747_s27 = smov [#allocation2]   ;;  %s3748_s13 = smov [#allocation6]  }
  0x4d   : > { %s179_s11 = sshll.u32 %s3747_s27, 4  ;;  %s203_s14 = sshll.u32 %s3748_s13, 4  ;;  %s180_s11 = int_to_ptr.vmem [resolvable:$true] %s179_s11  ;;  %s3916_s14 = int_to_ptr.vmem [resolvable:$true] %s203_s14 }
  0x4e   : > { %s3611_s15 = scalar_lea.hbm %s4358_s0, 32 }
  0x4f   : > { %p3612_p11 = scmp.ne.s32.totalorder %s4358_s0, %s3611_s15  ;;  %p3618_p7 = scmp.lt.u32.totalorder %s3611_s15, %s4358_s0 }
  0x51   : > { %p3614_p0 = pnand %p3612_p11, %p3859_p1 }
  0x53   : > { %p3615_p6 = pneg %p3614_p0 }
  0x55   : > { %p3620_p10 = pnand %p3618_p7, %p3615_p6 }
  0x57   : > { %3623 = shalt.err (!%p3620_p10)
}
  0x58   : > { %s3624_s17 = scalar_lea.vmem %s180_s11, 32  ;;  %p3632_p2 = scmp.lt.s32.totalorder %s180_s11, %s180_s11 }
  0x59   : > { %p3625_p12 = scmp.ne.s32.totalorder %s180_s11, %s3624_s17  ;;  %p3633_p3 = scmp.lt.s32.totalorder %s3624_s17, %s3624_s17 }
  0x5b   : > { %p3627_p5 = pnand %p3625_p12, %p3859_p1  ;;  %p3634_p4 = por %p3633_p3, %p3632_p2 }
  0x5d   : > { %p3628_p13 = pneg %p3627_p5 }
  0x5f   : > { %p3635_p9 = pnand %p3634_p4, %p3628_p13 }
  0x61   : > { %3638 = shalt.err (!%p3635_p9)
}
  0x62   : > { %p4382_p11 = scmp.ne.s32.totalorder %s4377_s7, 0  ;;  %s3639_s6 = scalar_lea.hbm %s4360_s2, 128 }
  0x63   : > { %p3640_p0 = scmp.ne.s32.totalorder %s4360_s2, %s3639_s6  ;;  %p3646_p9 = scmp.lt.u32.totalorder %s3639_s6, %s4360_s2 }
  0x64   : > { %3106 = dma.hbm_to_vmem [thread:$0]  (!%p4382_p11), %s4358_s0, 32, %s180_s11, [#allocation3]  }
  0x65   : > { %p3642_p6 = pnand %p3640_p0, %p3859_p1 }
  0x67   : > { %p3643_p7 = pneg %p3642_p6 }
  0x69   : > { %p3648_p10 = pnand %p3646_p9, %p3643_p7 }
  0x6b   : > { %3651 = shalt.err (!%p3648_p10)
}
  0x6c   : > { %s3652_s11 = scalar_lea.vmem %s3916_s14, 128  ;;  %p3660_p2 = scmp.lt.s32.totalorder %s3916_s14, %s3916_s14 }
  0x6d   : > { %p3653_p12 = scmp.ne.s32.totalorder %s3916_s14, %s3652_s11  ;;  %p3661_p3 = scmp.lt.s32.totalorder %s3652_s11, %s3652_s11 }
  0x6f   : > { %p3655_p5 = pnand %p3653_p12, %p3859_p1  ;;  %p3662_p4 = por %p3661_p3, %p3660_p2 }
  0x71   : > { %p3656_p13 = pneg %p3655_p5 }
  0x73   : > { %p3663_p0 = pnand %p3662_p4, %p3656_p13 }
  0x75   : > { %3666 = shalt.err (!%p3663_p0)
}
  0x76   : > { %3112 = dma.hbm_to_vmem [thread:$0]  (!%p4382_p11), %s4360_s2, 128, %s3916_s14, [#allocation5]  }
  0x77   : > { %s4383_s25 = sand.u32 1, %s3735_s20   ;;  %s3034_s17 = sshll.u32 %s3739_s21, 6 }
  0x78   : > { %s2752_s16 = sshll.u32 %s4383_s25, 2  ;;  %s3965_s1 = scalar_lea.hbm %s4362_s4, %s3034_s17 }
  0x79   : > { %s239_s7 = scalar_lea.vmem [#allocation9], %s2752_s16  ;;  %s3667_s6 = scalar_lea.hbm %s3965_s1, 64 }
  0x7a   : > { %s247_s30 = sshll.u32 %s239_s7, 4  ;;  %p3668_p1 = scmp.ne.s32.totalorder %s3965_s1, %s3667_s6  ;;  %s248_s30 = int_to_ptr.vmem [resolvable:$true] %s247_s30 }
  0x7b   : > { %p4384_p6 = pneg %p4381_p8  ;;  %s3672_s27 = scalar_lea.hbm %s4362_s4, 256 }
  0x7c   : > { %p3673_p9 = scmp.lt.u32.totalorder %s3965_s1, %s4362_s4  ;;  %p3674_p10 = scmp.lt.u32.totalorder %s3672_s27, %s3667_s6 }
  0x7d   : > { %p3670_p11 = pnand %p3668_p1, %p4384_p6  ;;  %p3676_p5 = scmp.lt.u32.totalorder %s3667_s6, %s3965_s1 }
  0x7e   : > { %p3675_p12 = por %p3674_p10, %p3673_p9 }
  0x7f   : > { %p3671_p7 = pneg %p3670_p11 }
  0x80   : > { %p3677_p13 = por %p3676_p5, %p3675_p12 }
  0x82   : > { %p3678_p2 = pnand %p3677_p13, %p3671_p7 }
  0x84   : > { %3681 = shalt.err (!%p3678_p2)
}
  0x85   : > { %s3682_s12 = scalar_lea.vmem %s248_s30, 64  ;;  %p4385_p4 = pmov %p4384_p6 }
  0x86   : > { %p3683_p3 = scmp.ne.s32.totalorder %s248_s30, %s3682_s12  ;;  %s3749_s11 = smov [#allocation9]  }
  0x87   : > { %s3687_s15 = sshll.u32 %s3749_s11, 4  ;;  %s3688_s15 = int_to_ptr.vmem [resolvable:$false] %s3687_s15 }
  0x88   : > { %p3685_p0 = pnand %p3683_p3, %p4385_p4  ;;  %s3689_s18 = scalar_lea.vmem %s3688_s15, 128 }
  0x89   : > { %p3690_p6 = scmp.lt.s32.totalorder %s248_s30, %s3688_s15  ;;  %p3691_p11 = scmp.lt.s32.totalorder %s3689_s18, %s3682_s12 }
  0x8a   : > { %p3686_p1 = pneg %p3685_p0 }
  0x8b   : > { %p3692_p9 = por %p3691_p11, %p3690_p6 }
  0x8d   : > { %p3693_p10 = pnand %p3692_p9, %p3686_p1 }
  0x8f   : > { %3696 = shalt.err (!%p3693_p10)
}
  0x90   : > { %3119 = dma.hbm_to_vmem [thread:$0]  (!%p4381_p8), %s3965_s1, 64, %s248_s30, %s3887_s26  }
  0x91   : > { %p4386_p7 = scmp.ne.s32.totalorder %s4376_s29, 0 }
  0x92   : > { %p4387_p12 = scmp.eq.s32.totalorder (!%p4386_p7), %s3802_s22, 0 }
  0x93   : > { %256 = sbr.rel (%p4386_p7) target bundleno = 808 (0x328), region = 40 }
  0x9a   : > { %3714 = dma.done.wait (%p4387_p12), [#allocation3], 32   ;;  %p4388_p5 = pmov %p4387_p12 }
  0x9c   : > { %3716 = vsyncadd (%p4388_p5), [#allocation3], 4294967264  ;;  %p4389_p13 = pmov %p4388_p5 }
  0x9d   : > { %p4390_p2 = pmov %p4388_p5 }
  0x9e   : > { %3718 = dma.done.wait (%p4389_p13), [#allocation5], 2176  }
  0x9f   : > { %3720 = vsyncadd (%p4390_p2), [#allocation5], 4294965120  ;;  %s270_s26 = sand.u32 1, %s3802_s22   ;;  %s272_s10 = sand.u32 1, %s3731_s19  }
  0xa0   : > { %s2759_s29 = sshll.u32 %s272_s10, 11  ;;  %s271_s25 = scalar_lea.sflag [#allocation8], %s270_s26 }
  0xa1   : > { %s4001_s16 = scalar_lea.vmem [#allocation7], %s2759_s29  ;;  %p4391_p8 = scmp.ne.s32.totalorder %s4375_s28, 0 }
  0xa3   : > { %3722 = dma.done.wait (%p4391_p8), %s271_s25, 32832  }
  0xa4   : > { %3724 = vsyncadd (%p4391_p8), %s271_s25, 4294934464  ;;  %v3750_v0 = vmov 0.0   ;;  %vm386_vm0 = vcmask 1041408   ;;  %vm3751_vm1 = vmmov 1   ;;  %v325_v2 = vld [vmem:[#allocation4 + $0x8] sm:$0xff]  ;;  %v324_v4 = vld [vmem:[#allocation4] sm:$0xff] }
  0xa5   : > { %475 = vmatprep.mubr.f32.mxu0 %v3750_v0  ;;  %546 = vmatprep.mubr.f32.mxu1 %v3750_v0  ;;  %vm4007_vm2 = vmpackc.low %vm386_vm0, %vm3751_vm1  ;;  %v333_v3 = vld [vmem:[#allocation4 + $0x48] sm:$0x3]  ;;  %v332_v6 = vld [vmem:[#allocation4 + $0x40] sm:$0x3]  ;;  %vm382_vm3 = vcmask 80896   ;;  %s2760_s28 = sshll.u32 %s272_s10, 2 }
  0xa6   : > { %v3035_v5 = vpack.c.bf16 %v333_v3, %v325_v2  ;;  %v327_v7 = vld [vmem:[#allocation4 + $0x18] sm:$0xff]  ;;  %v3038_v8 = vpack.c.bf16 %v332_v6, %v324_v4  ;;  %v326_v11 = vld [vmem:[#allocation4 + $0x10] sm:$0xff]  ;;  %v329_v15 = vld [vmem:[#allocation4 + $0x28] sm:$0xff]  ;;  %s283_s17 = scalar_lea.vmem [#allocation9], %s2760_s28  ;;  %s2761_s9 = sshll.u32 %s3802_s22, 2 }
  0xa7   : > { %v323_v9 = vld [vmem:[#allocation2] sm:$0x3]  ;;  %v335_v10 = vld [vmem:[#allocation4 + $0x58] sm:$0x3]  ;;  %v334_v12 = vld [vmem:[#allocation4 + $0x50] sm:$0x3] }
  0xa8   : > { %3037 = vmatprep.subr.msk.bf16.mxu0 %vm4007_vm2, %v3035_v5  ;;  %v3041_v13 = vpack.c.bf16 %v335_v10, %v327_v7  ;;  %v3044_v14 = vpack.c.bf16 %v334_v12, %v326_v11  ;;  %v337_v16 = vld [vmem:[#allocation4 + $0x68] sm:$0x3]  ;;  %v328_v17 = vld [vmem:[#allocation4 + $0x20] sm:$0xff]  ;;  %v331_v20 = vld [vmem:[#allocation4 + $0x38] sm:$0xff]  ;;  %p318_p3 = scmp.lt.s32.totalorder %s2761_s9, 15 }
  0xa9   : > { %3040 = vmatpush1.bf16.msk.msra.mxu0 %vm4007_vm2, %v3038_v8  ;;  %v3047_v18 = vpack.c.bf16 %v337_v16, %v329_v15  ;;  %v336_v19 = vld [vmem:[#allocation4 + $0x60] sm:$0x3]  ;;  %v339_v21 = vld [vmem:[#allocation4 + $0x78] sm:$0x3]  ;;  %v330_v24 = vld [vmem:[#allocation4 + $0x30] sm:$0xff] }
  0xaa   : > { %3043 = vmatprep.subr.msk.bf16.mxu1 %vm4007_vm2, %v3041_v13  ;;  %v3050_v22 = vpack.c.bf16 %v336_v19, %v328_v17  ;;  %v3053_v23 = vpack.c.bf16 %v339_v21, %v331_v20  ;;  %v338_v25 = vld [vmem:[#allocation4 + $0x70] sm:$0x3]  ;;  %v3171_v27 = vld [vmem:[%s4001_s16 + $0x4] ss:$16 sps:$4 sm:$0xff]   ;;  %v3169_v28 = vld [vmem:[%s4001_s16] ss:$16 sps:$4 sm:$0xff]  }
  0xab   : > { %3046 = vmatpush1.bf16.msk.msra.mxu1 %vm4007_vm2, %v3044_v14  ;;  %3049 = vmatprep.subr.msk.bf16.mxu0 %vm4007_vm2, %v3047_v18  ;;  %v3056_v26 = vpack.c.bf16 %v338_v25, %v330_v24  ;;  %v3174_v29 = vld [vmem:[%s4001_s16 + $0xc] ss:$16 sps:$4 sm:$0xff]   ;;  %v3177_v30 = vld [vmem:[%s4001_s16 + $0x24] ss:$16 sps:$4 sm:$0xff]   ;;  %v3172_v31 = vld [vmem:[%s4001_s16 + $0x8] ss:$16 sps:$4 sm:$0xff]  }
  0xac   : > { %2765 = vmatmul.mubr.msk.f32.vlgmr.msra.gmra.mrb[0].mxu0 %vm382_vm3, %v323_v9  ;;  %3055 = vmatprep.subr.msk.bf16.mxu1 %vm4007_vm2, %v3053_v23  ;;  %v3180_v32 = vld [vmem:[%s4001_s16 + $0x2c] ss:$16 sps:$4 sm:$0xff]   ;;  %v3175_v33 = vld [vmem:[%s4001_s16 + $0x20] ss:$16 sps:$4 sm:$0xff]   ;;  %v3183_v34 = vld [vmem:[%s4001_s16 + $0x44] ss:$16 sps:$4 sm:$0xff]  }
  0xad   : > { %3052 = vmatpush1.bf16.msk.msra.mxu0 %vm4007_vm2, %v3050_v22  ;;  %617 = vmatprep.mubr.f32.mxu0 %v3750_v0  ;;  %v3178_v35 = vld [vmem:[%s4001_s16 + $0x28] ss:$16 sps:$4 sm:$0xff]   ;;  %v3186_v36 = vld [vmem:[%s4001_s16 + $0x4c] ss:$16 sps:$4 sm:$0xff]   ;;  %v3181_v37 = vld [vmem:[%s4001_s16 + $0x40] ss:$16 sps:$4 sm:$0xff]  }
  0xae   : > { %2768 = vmatmul.mubr.msk.f32.vlgmr.msra.gmra.mrb[0].mxu1 %vm382_vm3, %v323_v9  ;;  %2269 = vmatprep.subr.bf16.mxu0 %v3171_v27  ;;  %v3189_v38 = vld [vmem:[%s4001_s16 + $0x64] ss:$16 sps:$4 sm:$0xff]   ;;  %v3184_v39 = vld [vmem:[%s4001_s16 + $0x48] ss:$16 sps:$4 sm:$0xff]   ;;  %v3192_v40 = vld [vmem:[%s4001_s16 + $0x6c] ss:$16 sps:$4 sm:$0xff]  }
  0xaf   : > { %3058 = vmatpush1.bf16.msk.msra.mxu1 %vm4007_vm2, %v3056_v26  ;;  %688 = vmatprep.mubr.f32.mxu1 %v3750_v0  ;;  %v3187_v41 = vld [vmem:[%s4001_s16 + $0x60] ss:$16 sps:$4 sm:$0xff]   ;;  %v3195_v42 = vld [vmem:[%s4001_s16 + $0x84] ss:$16 sps:$4 sm:$0xff]   ;;  %v3190_v43 = vld [vmem:[%s4001_s16 + $0x68] ss:$16 sps:$4 sm:$0xff]  }
  0xb0   : > { %2771 = vmatmul.mubr.msk.f32.vlgmr.msra.gmra.mrb[2].mxu0 %vm382_vm3, %v323_v9  ;;  %2433 = vmatprep.subr.bf16.mxu1 %v3174_v29  ;;  %v3198_v44 = vld [vmem:[%s4001_s16 + $0x8c] ss:$16 sps:$4 sm:$0xff]   ;;  %v3193_v45 = vld [vmem:[%s4001_s16 + $0x80] ss:$16 sps:$4 sm:$0xff]   ;;  %v3201_v46 = vld [vmem:[%s4001_s16 + $0xa4] ss:$16 sps:$4 sm:$0xff]   ;;  %v342_v29 = vlaneseq }
  0xb1   : > { %2270 = vmatpush1.bf16.msra.mxu0 %v3169_v28  ;;  %v3196_v47 = vld [vmem:[%s4001_s16 + $0x88] ss:$16 sps:$4 sm:$0xff]   ;;  %v3204_v48 = vld [vmem:[%s4001_s16 + $0xac] ss:$16 sps:$4 sm:$0xff]   ;;  %v3199_v49 = vld [vmem:[%s4001_s16 + $0xa0] ss:$16 sps:$4 sm:$0xff]  }
  0xb2   : > { %2774 = vmatmul.mubr.msk.f32.vlgmr.msra.gmra.mrb[2].mxu1 %vm382_vm3, %v323_v9  ;;  %2271 = vmatprep.subr.bf16.mxu0 %v3177_v30  ;;  %v3207_v50 = vld [vmem:[%s4001_s16 + $0xc4] ss:$16 sps:$4 sm:$0xff]   ;;  %v3202_v51 = vld [vmem:[%s4001_s16 + $0xa8] ss:$16 sps:$4 sm:$0xff]   ;;  %v3210_v52 = vld [vmem:[%s4001_s16 + $0xcc] ss:$16 sps:$4 sm:$0xff]  }
  0xb3   : > { %2434 = vmatpush1.bf16.msra.mxu1 %v3172_v31  ;;  %v3205_v53 = vld [vmem:[%s4001_s16 + $0xc0] ss:$16 sps:$4 sm:$0xff]   ;;  %v3213_v54 = vld [vmem:[%s4001_s16 + $0xe4] ss:$16 sps:$4 sm:$0xff]   ;;  %v3208_v55 = vld [vmem:[%s4001_s16 + $0xc8] ss:$16 sps:$4 sm:$0xff]  }
  0xb4   : > { %2435 = vmatprep.subr.bf16.mxu1 %v3180_v32  ;;  %v3216_v56 = vld [vmem:[%s4001_s16 + $0xec] ss:$16 sps:$4 sm:$0xff]   ;;  %v3211_v57 = vld [vmem:[%s4001_s16 + $0xe0] ss:$16 sps:$4 sm:$0xff]   ;;  %v3219_v58 = vld [vmem:[%s4001_s16 + $0x104] ss:$16 sps:$4 sm:$0xff]  }
  0xb5   : > { %2272 = vmatpush1.bf16.msra.mxu0 %v3175_v33  ;;  %v3214_v59 = vld [vmem:[%s4001_s16 + $0xe8] ss:$16 sps:$4 sm:$0xff]   ;;  %v3222_v60 = vld [vmem:[%s4001_s16 + $0x10c] ss:$16 sps:$4 sm:$0xff]   ;;  %v3217_v61 = vld [vmem:[%s4001_s16 + $0x100] ss:$16 sps:$4 sm:$0xff]  }
  0xb6   : > { %2273 = vmatprep.subr.bf16.mxu0 %v3183_v34  ;;  %v3220_v62 = vld [vmem:[%s4001_s16 + $0x108] ss:$16 sps:$4 sm:$0xff]   ;;  %v3225_v63 = vld [vmem:[%s4001_s16 + $0x124] ss:$16 sps:$4 sm:$0xff]   ;;  %v3223_v0 = vld [vmem:[%s4001_s16 + $0x120] ss:$16 sps:$4 sm:$0xff]  }
  0xb7   : > { %2436 = vmatpush1.bf16.msra.mxu1 %v3178_v35  ;;  %v3228_v1 = vld [vmem:[%s4001_s16 + $0x12c] ss:$16 sps:$4 sm:$0xff]   ;;  %v3231_v2 = vld [vmem:[%s4001_s16 + $0x144] ss:$16 sps:$4 sm:$0xff]   ;;  %v3226_v3 = vld [vmem:[%s4001_s16 + $0x128] ss:$16 sps:$4 sm:$0xff]  }
  0xb8   : > { %2437 = vmatprep.subr.bf16.mxu1 %v3186_v36  ;;  %v3234_v4 = vld [vmem:[%s4001_s16 + $0x14c] ss:$16 sps:$4 sm:$0xff]   ;;  %v3229_v5 = vld [vmem:[%s4001_s16 + $0x140] ss:$16 sps:$4 sm:$0xff]   ;;  %v3237_v6 = vld [vmem:[%s4001_s16 + $0x164] ss:$16 sps:$4 sm:$0xff]  }
  0xb9   : > { %2274 = vmatpush1.bf16.msra.mxu0 %v3181_v37  ;;  %v3232_v7 = vld [vmem:[%s4001_s16 + $0x148] ss:$16 sps:$4 sm:$0xff]   ;;  %v3240_v8 = vld [vmem:[%s4001_s16 + $0x16c] ss:$16 sps:$4 sm:$0xff]   ;;  %v3235_v9 = vld [vmem:[%s4001_s16 + $0x160] ss:$16 sps:$4 sm:$0xff]  }
  0xba   : > { %2275 = vmatprep.subr.bf16.mxu0 %v3189_v38  ;;  %v3243_v10 = vld [vmem:[%s4001_s16 + $0x184] ss:$16 sps:$4 sm:$0xff]   ;;  %v3238_v11 = vld [vmem:[%s4001_s16 + $0x168] ss:$16 sps:$4 sm:$0xff]   ;;  %v3246_v12 = vld [vmem:[%s4001_s16 + $0x18c] ss:$16 sps:$4 sm:$0xff]  }
  0xbb   : > { %2438 = vmatpush1.bf16.msra.mxu1 %v3184_v39  ;;  %v3241_v13 = vld [vmem:[%s4001_s16 + $0x180] ss:$16 sps:$4 sm:$0xff]   ;;  %v3249_v14 = vld [vmem:[%s4001_s16 + $0x1a4] ss:$16 sps:$4 sm:$0xff]   ;;  %v3244_v15 = vld [vmem:[%s4001_s16 + $0x188] ss:$16 sps:$4 sm:$0xff]  }
  0xbc   : > { %2439 = vmatprep.subr.bf16.mxu1 %v3192_v40  ;;  %v3252_v16 = vld [vmem:[%s4001_s16 + $0x1ac] ss:$16 sps:$4 sm:$0xff]   ;;  %v3247_v17 = vld [vmem:[%s4001_s16 + $0x1a0] ss:$16 sps:$4 sm:$0xff]   ;;  %v3250_v18 = vld [vmem:[%s4001_s16 + $0x1a8] ss:$16 sps:$4 sm:$0xff]  }
  0xbd   : > { %2276 = vmatpush1.bf16.msra.mxu0 %v3187_v41  ;;  %v3255_v19 = vld [vmem:[%s4001_s16 + $0x1c4] ss:$16 sps:$4 sm:$0xff]   ;;  %v3258_v20 = vld [vmem:[%s4001_s16 + $0x1cc] ss:$16 sps:$4 sm:$0xff]   ;;  %v3253_v21 = vld [vmem:[%s4001_s16 + $0x1c0] ss:$16 sps:$4 sm:$0xff]  }
  0xbe   : > { %2277 = vmatprep.subr.bf16.mxu0 %v3195_v42  ;;  %v3256_v22 = vld [vmem:[%s4001_s16 + $0x1c8] ss:$16 sps:$4 sm:$0xff]   ;;  %v3261_v23 = vld [vmem:[%s4001_s16 + $0x1e4] ss:$16 sps:$4 sm:$0xff]   ;;  %v3264_v24 = vld [vmem:[%s4001_s16 + $0x1ec] ss:$16 sps:$4 sm:$0xff]  }
  0xbf   : > { %2440 = vmatpush1.bf16.msra.mxu1 %v3190_v43  ;;  %v3259_v25 = vld [vmem:[%s4001_s16 + $0x1e0] ss:$16 sps:$4 sm:$0xff]   ;;  %v3262_v26 = vld [vmem:[%s4001_s16 + $0x1e8] ss:$16 sps:$4 sm:$0xff]   ;;  %v3267_v27 = vld [vmem:[%s4001_s16 + $0x204] ss:$16 sps:$4 sm:$0xff]  }
  0xc0   : > { %2441 = vmatprep.subr.bf16.mxu1 %v3198_v44  ;;  %v3270_v28 = vld [vmem:[%s4001_s16 + $0x20c] ss:$16 sps:$4 sm:$0xff]   ;;  %v4097_v30 = vshrl.u32 %v342_v29, 7  ;;  %v3327_v29 = vld [vmem:[%s4001_s16 + $0x344] ss:$16 sps:$4 sm:$0xff]   ;;  %s4400_s9 = smov (!%p318_p3, %s2761_s9), 15 }
  0xc1   : > { %2278 = vmatpush1.bf16.msra.mxu0 %v3193_v45  ;;  %v4100_v32 = vld [vmem:[#allocation6] sm:$0xff]  ;;  %s2762_s22 = sshll.u32 %s4400_s9, 1 }
  0xc2   : > { %2279 = vmatprep.subr.bf16.mxu0 %v3201_v46  ;;  %v344_v31 = vsub.s32 0, %v4097_v30  ;;  %v348_v33 = vsub.s32 1, %v4097_v30  ;;  %v356_v34 = vsub.s32 3, %v4097_v30  ;;  %s321_s7 = scalar_lea.vmem %s4363_s5, %s2762_s22 }
  0xc3   : > { %2442 = vmatpush1.bf16.msra.mxu1 %v3196_v47 }
  0xc4   : > { %2443 = vmatprep.subr.bf16.mxu1 %v3204_v48  ;;  %v345_v35 = vrot.slane %v4100_v32, %v344_v31  ;;  %v349_v36 = vrot.slane %v4100_v32, %v348_v33  ;;  %v357_v38 = vrot.slane %v4100_v32, %v356_v34 }
  0xc5   : > { %2280 = vmatpush1.bf16.msra.mxu0 %v3199_v49 }
  0xc6   : > { %2281 = vmatprep.subr.bf16.mxu0 %v3207_v50  ;;  %v3265_v50 = vld [vmem:[%s4001_s16 + $0x200] ss:$16 sps:$4 sm:$0xff]  }
  0xc7   : > { %2444 = vmatpush1.bf16.msra.mxu1 %v3202_v51  ;;  %v3268_v51 = vld [vmem:[%s4001_s16 + $0x208] ss:$16 sps:$4 sm:$0xff]  }
  0xc8   : > { %2445 = vmatprep.subr.bf16.mxu1 %v3210_v52 }
  0xc9   : > { %2282 = vmatpush1.bf16.msra.mxu0 %v3205_v53 }
  0xca   : > { %2283 = vmatprep.subr.bf16.mxu0 %v3213_v54  ;;  %v3273_v54 = vld [vmem:[%s4001_s16 + $0x224] ss:$16 sps:$4 sm:$0xff]  }
  0xcb   : > { %2446 = vmatpush1.bf16.msra.mxu1 %v3208_v55  ;;  %v3276_v55 = vld [vmem:[%s4001_s16 + $0x22c] ss:$16 sps:$4 sm:$0xff]  }
  0xcc   : > { %2447 = vmatprep.subr.bf16.mxu1 %v3216_v56 }
  0xcd   : > { %2284 = vmatpush1.bf16.msra.mxu0 %v3211_v57  ;;  %v3271_v57 = vld [vmem:[%s4001_s16 + $0x220] ss:$16 sps:$4 sm:$0xff]  }
  0xce   : > { %2285 = vmatprep.subr.bf16.mxu0 %v3219_v58  ;;  %v3274_v58 = vld [vmem:[%s4001_s16 + $0x228] ss:$16 sps:$4 sm:$0xff]  }
  0xcf   : > { %2448 = vmatpush1.bf16.msra.mxu1 %v3214_v59  ;;  %v3279_v59 = vld [vmem:[%s4001_s16 + $0x244] ss:$16 sps:$4 sm:$0xff]  }
  0xd0   : > { %2449 = vmatprep.subr.bf16.mxu1 %v3222_v60  ;;  %v3282_v60 = vld [vmem:[%s4001_s16 + $0x24c] ss:$16 sps:$4 sm:$0xff]  }
  0xd1   : > { %2286 = vmatpush1.bf16.msra.mxu0 %v3217_v61  ;;  %v3277_v61 = vld [vmem:[%s4001_s16 + $0x240] ss:$16 sps:$4 sm:$0xff]  }
  0xd2   : > { %2287 = vmatprep.subr.bf16.mxu0 %v3225_v63  ;;  %v3285_v63 = vld [vmem:[%s4001_s16 + $0x264] ss:$16 sps:$4 sm:$0xff]  }
  0xd3   : > { %2450 = vmatpush1.bf16.msra.mxu1 %v3220_v62  ;;  %v3280_v62 = vld [vmem:[%s4001_s16 + $0x248] ss:$16 sps:$4 sm:$0xff]  }
  0xd4   : > { %2451 = vmatprep.subr.bf16.mxu1 %v3228_v1  ;;  %v3283_v1 = vld [vmem:[%s4001_s16 + $0x260] ss:$16 sps:$4 sm:$0xff]  }
  0xd5   : > { %2288 = vmatpush1.bf16.msra.mxu0 %v3223_v0  ;;  %v3288_v0 = vld [vmem:[%s4001_s16 + $0x26c] ss:$16 sps:$4 sm:$0xff]  }
  0xd6   : > { %2289 = vmatprep.subr.bf16.mxu0 %v3231_v2  ;;  %v3286_v2 = vld [vmem:[%s4001_s16 + $0x268] ss:$16 sps:$4 sm:$0xff]  }
  0xd7   : > { %2452 = vmatpush1.bf16.msra.mxu1 %v3226_v3  ;;  %v3291_v3 = vld [vmem:[%s4001_s16 + $0x284] ss:$16 sps:$4 sm:$0xff]  }
  0xd8   : > { %2453 = vmatprep.subr.bf16.mxu1 %v3234_v4  ;;  %v3294_v4 = vld [vmem:[%s4001_s16 + $0x28c] ss:$16 sps:$4 sm:$0xff]  }
  0xd9   : > { %2290 = vmatpush1.bf16.msra.mxu0 %v3229_v5  ;;  %v3289_v5 = vld [vmem:[%s4001_s16 + $0x280] ss:$16 sps:$4 sm:$0xff]  }
  0xda   : > { %2291 = vmatprep.subr.bf16.mxu0 %v3237_v6  ;;  %v3292_v6 = vld [vmem:[%s4001_s16 + $0x288] ss:$16 sps:$4 sm:$0xff]  }
  0xdb   : > { %2454 = vmatpush1.bf16.msra.mxu1 %v3232_v7  ;;  %v3297_v7 = vld [vmem:[%s4001_s16 + $0x2a4] ss:$16 sps:$4 sm:$0xff]  }
  0xdc   : > { %2455 = vmatprep.subr.bf16.mxu1 %v3240_v8  ;;  %v3300_v8 = vld [vmem:[%s4001_s16 + $0x2ac] ss:$16 sps:$4 sm:$0xff]  }
  0xdd   : > { %2292 = vmatpush1.bf16.msra.mxu0 %v3235_v9  ;;  %v3295_v9 = vld [vmem:[%s4001_s16 + $0x2a0] ss:$16 sps:$4 sm:$0xff]  }
  0xde   : > { %2293 = vmatprep.subr.bf16.mxu0 %v3243_v10  ;;  %v3298_v10 = vld [vmem:[%s4001_s16 + $0x2a8] ss:$16 sps:$4 sm:$0xff]  }
  0xdf   : > { %2456 = vmatpush1.bf16.msra.mxu1 %v3238_v11 }
  0xe0   : > { %2457 = vmatprep.subr.bf16.mxu1 %v3246_v12  ;;  %v3303_v12 = vld [vmem:[%s4001_s16 + $0x2c4] ss:$16 sps:$4 sm:$0xff]  }
  0xe1   : > { %2294 = vmatpush1.bf16.msra.mxu0 %v3241_v13  ;;  %v3306_v13 = vld [vmem:[%s4001_s16 + $0x2cc] ss:$16 sps:$4 sm:$0xff]  }
  0xe2   : > { %2295 = vmatprep.subr.bf16.mxu0 %v3249_v14 }
  0xe3   : > { %2458 = vmatpush1.bf16.msra.mxu1 %v3244_v15  ;;  %v3301_v15 = vld [vmem:[%s4001_s16 + $0x2c0] ss:$16 sps:$4 sm:$0xff]  }
  0xe4   : > { %2459 = vmatprep.subr.bf16.mxu1 %v3252_v16  ;;  %v3304_v16 = vld [vmem:[%s4001_s16 + $0x2c8] ss:$16 sps:$4 sm:$0xff]  }
  0xe5   : > { %2296 = vmatpush1.bf16.msra.mxu0 %v3247_v17  ;;  %v3309_v17 = vld [vmem:[%s4001_s16 + $0x2e4] ss:$16 sps:$4 sm:$0xff]  }
  0xe6   : > { %2297 = vmatprep.subr.bf16.mxu0 %v3255_v19  ;;  %v3307_v19 = vld [vmem:[%s4001_s16 + $0x2e0] ss:$16 sps:$4 sm:$0xff]  }
  0xe7   : > { %2460 = vmatpush1.bf16.msra.mxu1 %v3250_v18  ;;  %v3312_v18 = vld [vmem:[%s4001_s16 + $0x2ec] ss:$16 sps:$4 sm:$0xff]  }
  0xe8   : > { %2461 = vmatprep.subr.bf16.mxu1 %v3258_v20  ;;  %v3310_v20 = vld [vmem:[%s4001_s16 + $0x2e8] ss:$16 sps:$4 sm:$0xff]  }
  0xe9   : > { %2298 = vmatpush1.bf16.msra.mxu0 %v3253_v21  ;;  %v3315_v21 = vld [vmem:[%s4001_s16 + $0x304] ss:$16 sps:$4 sm:$0xff]  }
  0xea   : > { %2299 = vmatprep.subr.bf16.mxu0 %v3261_v23  ;;  %v3313_v23 = vld [vmem:[%s4001_s16 + $0x300] ss:$16 sps:$4 sm:$0xff]  }
  0xeb   : > { %2462 = vmatpush1.bf16.msra.mxu1 %v3256_v22  ;;  %v3318_v22 = vld [vmem:[%s4001_s16 + $0x30c] ss:$16 sps:$4 sm:$0xff]  }
  0xec   : > { %2463 = vmatprep.subr.bf16.mxu1 %v3264_v24  ;;  %v3316_v24 = vld [vmem:[%s4001_s16 + $0x308] ss:$16 sps:$4 sm:$0xff]  }
  0xed   : > { %2300 = vmatpush1.bf16.msra.mxu0 %v3259_v25  ;;  %v3321_v25 = vld [vmem:[%s4001_s16 + $0x324] ss:$16 sps:$4 sm:$0xff]  }
  0xee   : > { %2310 = vmatprep.subr.bf16.mxu0 %v3267_v27  ;;  %v3319_v27 = vld [vmem:[%s4001_s16 + $0x320] ss:$16 sps:$4 sm:$0xff]  }
  0xef   : > { %2464 = vmatpush1.bf16.msra.mxu1 %v3262_v26  ;;  %v3324_v26 = vld [vmem:[%s4001_s16 + $0x32c] ss:$16 sps:$4 sm:$0xff]  }
  0xf0   : > { %2474 = vmatprep.subr.bf16.mxu1 %v3270_v28  ;;  %v3322_v28 = vld [vmem:[%s4001_s16 + $0x328] ss:$16 sps:$4 sm:$0xff]  }
 0x17f   : > { %v477_v37 = vpop.f32.mrb[0].mxu0 }
 0x180   : > { %v478_v39 = vadd.f32 %v477_v37, %v345_v35  ;;  %v479_v40 = vpop.f32.mrb[1].mxu0  ;;  %v3330_v35 = vld [vmem:[%s4001_s16 + $0x34c] ss:$16 sps:$4 sm:$0xff]   ;;  %v3328_v37 = vld [vmem:[%s4001_s16 + $0x348] ss:$16 sps:$4 sm:$0xff]  }
 0x181   : > { %v480_v41 = vadd.f32 %v479_v40, %v349_v36  ;;  %v4113_v42 = vpop.f32.mrb[0].mxu1  ;;  %v3325_v36 = vld [vmem:[%s4001_s16 + $0x340] ss:$16 sps:$4 sm:$0xff]  }
 0x182   : > { %v695_v43 = vmax.f32 %v478_v39, 0.0  ;;  %v550_v44 = vpop.f32.mrb[1].mxu1  ;;  %v3336_v39 = vld [vmem:[%s4001_s16 + $0x36c] ss:$16 sps:$4 sm:$0xff]   ;;  %v3331_v40 = vld [vmem:[%s4001_s16 + $0x360] ss:$16 sps:$4 sm:$0xff]  }
 0x183   : > { %v696_v45 = vmax.f32 %v480_v41, 0.0  ;;  %v551_v46 = vadd.f32 %v550_v44, %v357_v38  ;;  %v4115_v47 = vpop.f32.mrb[2].mxu0  ;;  %v3333_v38 = vld [vmem:[%s4001_s16 + $0x364] ss:$16 sps:$4 sm:$0xff]   ;;  %v3334_v41 = vld [vmem:[%s4001_s16 + $0x368] ss:$16 sps:$4 sm:$0xff]  }
 0x184   : > { %v4117_v48 = vpop.f32.mrb[3].mxu0  ;;  %v703_v53 = vpack.c.bf16 %v695_v43, %v695_v43  ;;  %v3339_v43 = vld [vmem:[%s4001_s16 + $0x384] ss:$16 sps:$4 sm:$0xff]   ;;  %v3342_v44 = vld [vmem:[%s4001_s16 + $0x38c] ss:$16 sps:$4 sm:$0xff]  }
 0x185   : > { %v704_v49 = vpack.c.bf16 %v696_v45, %v696_v45  ;;  %v698_v52 = vmax.f32 %v551_v46, 0.0  ;;  %v4141_v11 = vpop.f32.mrb[2].mxu1  ;;  %v352_v45 = vsub.s32 2, %v4097_v30  ;;  %v3337_v46 = vld [vmem:[%s4001_s16 + $0x380] ss:$16 sps:$4 sm:$0xff]  }
 0x186   : > { %v4145_v14 = vpop.f32.mrb[3].mxu1 }
 0x187   : > { %2301 = vmatprep.mubr.bf16.mxu0 %v704_v49  ;;  %2465 = vmatprep.mubr.bf16.mxu1 %v704_v49  ;;  %v706_v56 = vpack.c.bf16 %v698_v52, %v698_v52  ;;  %v3340_v49 = vld [vmem:[%s4001_s16 + $0x388] ss:$16 sps:$4 sm:$0xff]   ;;  %v364_v52 = vsub.s32 5, %v4097_v30 }
 0x188   : > { %2302 = vmatmul.mubr.bf16.vlgmr.msra.gmra.mrb[4].mxu0 %v703_v53  ;;  %2466 = vmatmul.mubr.bf16.vlgmr.msra.gmra.mrb[4].mxu1 %v703_v53  ;;  %v353_v53 = vrot.slane %v4100_v32, %v352_v45 }
 0x189   : > { %2311 = vmatpush1.bf16.msra.mxu0 %v3265_v50  ;;  %2475 = vmatpush1.bf16.msra.mxu1 %v3268_v51  ;;  %v3345_v50 = vld [vmem:[%s4001_s16 + $0x3a4] ss:$16 sps:$4 sm:$0xff]   ;;  %v3348_v51 = vld [vmem:[%s4001_s16 + $0x3ac] ss:$16 sps:$4 sm:$0xff]  }
 0x18a   : > { %2312 = vmatprep.subr.bf16.mxu0 %v3273_v54  ;;  %2476 = vmatprep.subr.bf16.mxu1 %v3276_v55  ;;  %v3343_v54 = vld [vmem:[%s4001_s16 + $0x3a0] ss:$16 sps:$4 sm:$0xff]   ;;  %v3346_v55 = vld [vmem:[%s4001_s16 + $0x3a8] ss:$16 sps:$4 sm:$0xff]  }
 0x18b   : > { %2342 = vmatprep.mubr.bf16.mxu0 %v706_v56  ;;  %2506 = vmatprep.mubr.bf16.mxu1 %v706_v56  ;;  %v3351_v56 = vld [vmem:[%s4001_s16 + $0x3c4] ss:$16 sps:$4 sm:$0xff]  }
 0x18d   : > { %2313 = vmatpush1.bf16.msra.mxu0 %v3271_v57  ;;  %2477 = vmatpush1.bf16.msra.mxu1 %v3274_v58  ;;  %v3354_v57 = vld [vmem:[%s4001_s16 + $0x3cc] ss:$16 sps:$4 sm:$0xff]   ;;  %v365_v58 = vrot.slane %v4100_v32, %v364_v52  ;;  %v3417_v52 = vld [vmem:[%s4001_s16 + $0x524] ss:$16 sps:$4 sm:$0xff]  }
 0x18e   : > { %2314 = vmatprep.subr.bf16.mxu0 %v3279_v59  ;;  %2478 = vmatprep.subr.bf16.mxu1 %v3282_v60  ;;  %v549_v59 = vadd.f32 %v4113_v42, %v353_v53  ;;  %v3349_v60 = vld [vmem:[%s4001_s16 + $0x3c0] ss:$16 sps:$4 sm:$0xff]   ;;  %v3420_v53 = vld [vmem:[%s4001_s16 + $0x52c] ss:$16 sps:$4 sm:$0xff]  }
 0x18f   : > { %v3355_v42 = vld [vmem:[%s4001_s16 + $0x3e0] ss:$16 sps:$4 sm:$0xff]  }
 0x191   : > { %2315 = vmatpush1.bf16.msra.mxu0 %v3277_v61  ;;  %2479 = vmatpush1.bf16.msra.mxu1 %v3280_v62  ;;  %v3352_v61 = vld [vmem:[%s4001_s16 + $0x3c8] ss:$16 sps:$4 sm:$0xff]   ;;  %v3357_v62 = vld [vmem:[%s4001_s16 + $0x3e4] ss:$16 sps:$4 sm:$0xff]  }
 0x192   : > { %2316 = vmatprep.subr.bf16.mxu0 %v3285_v63  ;;  %2480 = vmatprep.subr.bf16.mxu1 %v3288_v0  ;;  %v3360_v63 = vld [vmem:[%s4001_s16 + $0x3ec] ss:$16 sps:$4 sm:$0xff]   ;;  %v622_v0 = vadd.f32 %v4117_v48, %v365_v58  ;;  %v3364_v48 = vld [vmem:[%s4001_s16 + $0x408] ss:$16 sps:$4 sm:$0xff]   ;;  %v3421_v58 = vld [vmem:[%s4001_s16 + $0x540] ss:$16 sps:$4 sm:$0xff]  }
 0x195   : > { %2317 = vmatpush1.bf16.msra.mxu0 %v3283_v1  ;;  %2481 = vmatpush1.bf16.msra.mxu1 %v3286_v2  ;;  %v697_v1 = vmax.f32 %v549_v59, 0.0  ;;  %v3358_v2 = vld [vmem:[%s4001_s16 + $0x3e8] ss:$16 sps:$4 sm:$0xff]  }
 0x196   : > { %2318 = vmatprep.subr.bf16.mxu0 %v3291_v3  ;;  %2482 = vmatprep.subr.bf16.mxu1 %v3294_v4  ;;  %v3363_v3 = vld [vmem:[%s4001_s16 + $0x404] ss:$16 sps:$4 sm:$0xff]   ;;  %v3366_v4 = vld [vmem:[%s4001_s16 + $0x40c] ss:$16 sps:$4 sm:$0xff]   ;;  %v3424_v59 = vld [vmem:[%s4001_s16 + $0x548] ss:$16 sps:$4 sm:$0xff]  }
 0x199   : > { %2319 = vmatpush1.bf16.msra.mxu0 %v3289_v5  ;;  %2483 = vmatpush1.bf16.msra.mxu1 %v3292_v6  ;;  %v700_v5 = vmax.f32 %v622_v0, 0.0  ;;  %v705_v6 = vpack.c.bf16 %v697_v1, %v697_v1  ;;  %v3435_v0 = vld [vmem:[%s4001_s16 + $0x584] ss:$16 sps:$4 sm:$0xff]   ;;  %v3438_v1 = vld [vmem:[%s4001_s16 + $0x58c] ss:$16 sps:$4 sm:$0xff]  }
 0x19a   : > { %2320 = vmatprep.subr.bf16.mxu0 %v3297_v7  ;;  %2484 = vmatprep.subr.bf16.mxu1 %v3300_v8  ;;  %v3361_v7 = vld [vmem:[%s4001_s16 + $0x400] ss:$16 sps:$4 sm:$0xff]   ;;  %v3369_v8 = vld [vmem:[%s4001_s16 + $0x424] ss:$16 sps:$4 sm:$0xff]  }
 0x19d   : > { %2321 = vmatpush1.bf16.msra.mxu0 %v3295_v9  ;;  %2485 = vmatpush1.bf16.msra.mxu1 %v3298_v10  ;;  %v3372_v9 = vld [vmem:[%s4001_s16 + $0x42c] ss:$16 sps:$4 sm:$0xff]   ;;  %v708_v10 = vpack.c.bf16 %v700_v5, %v700_v5 }
 0x19e   : > { %2322 = vmatprep.subr.bf16.mxu0 %v3303_v12  ;;  %2486 = vmatprep.subr.bf16.mxu1 %v3306_v13  ;;  %v3367_v12 = vld [vmem:[%s4001_s16 + $0x420] ss:$16 sps:$4 sm:$0xff]   ;;  %v3370_v13 = vld [vmem:[%s4001_s16 + $0x428] ss:$16 sps:$4 sm:$0xff]   ;;  %v3444_v5 = vld [vmem:[%s4001_s16 + $0x5ac] ss:$16 sps:$4 sm:$0xff]  }
 0x1a1   : > { %2323 = vmatpush1.bf16.msra.mxu0 %v3301_v15  ;;  %2487 = vmatpush1.bf16.msra.mxu1 %v3304_v16  ;;  %v3375_v15 = vld [vmem:[%s4001_s16 + $0x444] ss:$16 sps:$4 sm:$0xff]   ;;  %v3378_v16 = vld [vmem:[%s4001_s16 + $0x44c] ss:$16 sps:$4 sm:$0xff]  }
 0x1a2   : > { %2324 = vmatprep.subr.bf16.mxu0 %v3309_v17  ;;  %2488 = vmatprep.subr.bf16.mxu1 %v3312_v18  ;;  %v3373_v17 = vld [vmem:[%s4001_s16 + $0x440] ss:$16 sps:$4 sm:$0xff]   ;;  %v3376_v18 = vld [vmem:[%s4001_s16 + $0x448] ss:$16 sps:$4 sm:$0xff]  }
 0x1a5   : > { %2325 = vmatpush1.bf16.msra.mxu0 %v3307_v19  ;;  %2489 = vmatpush1.bf16.msra.mxu1 %v3310_v20  ;;  %v3381_v19 = vld [vmem:[%s4001_s16 + $0x464] ss:$16 sps:$4 sm:$0xff]   ;;  %v3384_v20 = vld [vmem:[%s4001_s16 + $0x46c] ss:$16 sps:$4 sm:$0xff]  }
 0x1a6   : > { %2326 = vmatprep.subr.bf16.mxu0 %v3315_v21  ;;  %2490 = vmatprep.subr.bf16.mxu1 %v3318_v22  ;;  %v3379_v21 = vld [vmem:[%s4001_s16 + $0x460] ss:$16 sps:$4 sm:$0xff]   ;;  %v3382_v22 = vld [vmem:[%s4001_s16 + $0x468] ss:$16 sps:$4 sm:$0xff]  }
 0x1a9   : > { %2327 = vmatpush1.bf16.msra.mxu0 %v3313_v23  ;;  %2491 = vmatpush1.bf16.msra.mxu1 %v3316_v24  ;;  %v3387_v23 = vld [vmem:[%s4001_s16 + $0x484] ss:$16 sps:$4 sm:$0xff]   ;;  %v3390_v24 = vld [vmem:[%s4001_s16 + $0x48c] ss:$16 sps:$4 sm:$0xff]  }
 0x1aa   : > { %2328 = vmatprep.subr.bf16.mxu0 %v3321_v25  ;;  %2492 = vmatprep.subr.bf16.mxu1 %v3324_v26  ;;  %v3385_v25 = vld [vmem:[%s4001_s16 + $0x480] ss:$16 sps:$4 sm:$0xff]   ;;  %v3388_v26 = vld [vmem:[%s4001_s16 + $0x488] ss:$16 sps:$4 sm:$0xff]  }
 0x1ad   : > { %2329 = vmatpush1.bf16.msra.mxu0 %v3319_v27  ;;  %2493 = vmatpush1.bf16.msra.mxu1 %v3322_v28  ;;  %v3393_v27 = vld [vmem:[%s4001_s16 + $0x4a4] ss:$16 sps:$4 sm:$0xff]   ;;  %v3396_v28 = vld [vmem:[%s4001_s16 + $0x4ac] ss:$16 sps:$4 sm:$0xff]  }
 0x1ae   : > { %2330 = vmatprep.subr.bf16.mxu0 %v3327_v29  ;;  %2494 = vmatprep.subr.bf16.mxu1 %v3330_v35  ;;  %v3391_v29 = vld [vmem:[%s4001_s16 + $0x4a0] ss:$16 sps:$4 sm:$0xff]   ;;  %v3394_v35 = vld [vmem:[%s4001_s16 + $0x4a8] ss:$16 sps:$4 sm:$0xff]  }
 0x1b1   : > { %2331 = vmatpush1.bf16.msra.mxu0 %v3325_v36  ;;  %2495 = vmatpush1.bf16.msra.mxu1 %v3328_v37  ;;  %v3399_v36 = vld [vmem:[%s4001_s16 + $0x4c4] ss:$16 sps:$4 sm:$0xff]   ;;  %v3402_v37 = vld [vmem:[%s4001_s16 + $0x4cc] ss:$16 sps:$4 sm:$0xff]  }
 0x1b2   : > { %2332 = vmatprep.subr.bf16.mxu0 %v3333_v38  ;;  %2496 = vmatprep.subr.bf16.mxu1 %v3336_v39  ;;  %v3397_v38 = vld [vmem:[%s4001_s16 + $0x4c0] ss:$16 sps:$4 sm:$0xff]   ;;  %v3400_v39 = vld [vmem:[%s4001_s16 + $0x4c8] ss:$16 sps:$4 sm:$0xff]  }
 0x1b5   : > { %2333 = vmatpush1.bf16.msra.mxu0 %v3331_v40  ;;  %2497 = vmatpush1.bf16.msra.mxu1 %v3334_v41  ;;  %v3405_v40 = vld [vmem:[%s4001_s16 + $0x4e4] ss:$16 sps:$4 sm:$0xff]   ;;  %v3408_v41 = vld [vmem:[%s4001_s16 + $0x4ec] ss:$16 sps:$4 sm:$0xff]  }
 0x1b6   : > { %2334 = vmatprep.subr.bf16.mxu0 %v3339_v43  ;;  %2498 = vmatprep.subr.bf16.mxu1 %v3342_v44  ;;  %v3403_v43 = vld [vmem:[%s4001_s16 + $0x4e0] ss:$16 sps:$4 sm:$0xff]   ;;  %v3406_v44 = vld [vmem:[%s4001_s16 + $0x4e8] ss:$16 sps:$4 sm:$0xff]  }
 0x1b9   : > { %2335 = vmatpush1.bf16.msra.mxu0 %v3337_v46  ;;  %2499 = vmatpush1.bf16.msra.mxu1 %v3340_v49  ;;  %v3411_v46 = vld [vmem:[%s4001_s16 + $0x504] ss:$16 sps:$4 sm:$0xff]   ;;  %v3414_v49 = vld [vmem:[%s4001_s16 + $0x50c] ss:$16 sps:$4 sm:$0xff]  }
 0x1ba   : > { %2336 = vmatprep.subr.bf16.mxu0 %v3345_v50  ;;  %2500 = vmatprep.subr.bf16.mxu1 %v3348_v51  ;;  %v3409_v50 = vld [vmem:[%s4001_s16 + $0x500] ss:$16 sps:$4 sm:$0xff]   ;;  %v3412_v51 = vld [vmem:[%s4001_s16 + $0x508] ss:$16 sps:$4 sm:$0xff]  }
 0x1bd   : > { %2337 = vmatpush1.bf16.msra.mxu0 %v3343_v54  ;;  %2501 = vmatpush1.bf16.msra.mxu1 %v3346_v55  ;;  %v3415_v54 = vld [vmem:[%s4001_s16 + $0x520] ss:$16 sps:$4 sm:$0xff]   ;;  %v3418_v55 = vld [vmem:[%s4001_s16 + $0x528] ss:$16 sps:$4 sm:$0xff]  }
 0x1be   : > { %2338 = vmatprep.subr.bf16.mxu0 %v3351_v56  ;;  %2502 = vmatprep.subr.bf16.mxu1 %v3354_v57  ;;  %v3423_v56 = vld [vmem:[%s4001_s16 + $0x544] ss:$16 sps:$4 sm:$0xff]   ;;  %v3426_v57 = vld [vmem:[%s4001_s16 + $0x54c] ss:$16 sps:$4 sm:$0xff]  }
 0x1c1   : > { %2339 = vmatpush1.bf16.msra.mxu0 %v3349_v60  ;;  %2503 = vmatpush1.bf16.msra.mxu1 %v3352_v61  ;;  %v3429_v60 = vld [vmem:[%s4001_s16 + $0x564] ss:$16 sps:$4 sm:$0xff]   ;;  %v3432_v61 = vld [vmem:[%s4001_s16 + $0x56c] ss:$16 sps:$4 sm:$0xff]  }
 0x1c2   : > { %2340 = vmatprep.subr.bf16.mxu0 %v3357_v62  ;;  %2504 = vmatprep.subr.bf16.mxu1 %v3360_v63  ;;  %v3427_v62 = vld [vmem:[%s4001_s16 + $0x560] ss:$16 sps:$4 sm:$0xff]   ;;  %v3430_v63 = vld [vmem:[%s4001_s16 + $0x568] ss:$16 sps:$4 sm:$0xff]  }
 0x1c5   : > { %2341 = vmatpush1.bf16.msra.mxu0 %v3355_v42  ;;  %2505 = vmatpush1.bf16.msra.mxu1 %v3358_v2  ;;  %v360_v42 = vsub.s32 4, %v4097_v30  ;;  %v3433_v2 = vld [vmem:[%s4001_s16 + $0x580] ss:$16 sps:$4 sm:$0xff]  }
 0x1c6   : > { %2351 = vmatprep.subr.bf16.mxu0 %v3363_v3  ;;  %2515 = vmatprep.subr.bf16.mxu1 %v3366_v4  ;;  %v3436_v3 = vld [vmem:[%s4001_s16 + $0x588] ss:$16 sps:$4 sm:$0xff]   ;;  %v3441_v4 = vld [vmem:[%s4001_s16 + $0x5a4] ss:$16 sps:$4 sm:$0xff]  }
 0x1c8   : > { %2343 = vmatmul.mubr.bf16.vlgmr.msra.gmra.mrb[4].mxu0 %v705_v6  ;;  %2507 = vmatmul.mubr.bf16.vlgmr.msra.gmra.mrb[4].mxu1 %v705_v6  ;;  %v372_v6 = vsub.s32 7, %v4097_v30 }
 0x1c9   : > { %2352 = vmatpush1.bf16.msra.mxu0 %v3361_v7  ;;  %2516 = vmatpush1.bf16.msra.mxu1 %v3364_v48  ;;  %v361_v7 = vrot.slane %v4100_v32, %v360_v42  ;;  %v3439_v48 = vld [vmem:[%s4001_s16 + $0x5a0] ss:$16 sps:$4 sm:$0xff]   ;;  %v3510_v42 = vld [vmem:[%s4001_s16 + $0x70c] ss:$16 sps:$4 sm:$0xff]  }
 0x1ca   : > { %2353 = vmatprep.subr.bf16.mxu0 %v3369_v8  ;;  %2517 = vmatprep.subr.bf16.mxu1 %v3372_v9  ;;  %v3442_v8 = vld [vmem:[%s4001_s16 + $0x5a8] ss:$16 sps:$4 sm:$0xff]   ;;  %v3447_v9 = vld [vmem:[%s4001_s16 + $0x5c4] ss:$16 sps:$4 sm:$0xff]  }
 0x1cb   : > { %2383 = vmatprep.mubr.bf16.mxu0 %v708_v10  ;;  %2547 = vmatprep.mubr.bf16.mxu1 %v708_v10  ;;  %v3450_v10 = vld [vmem:[%s4001_s16 + $0x5cc] ss:$16 sps:$4 sm:$0xff]  }
 0x1cd   : > { %2354 = vmatpush1.bf16.msra.mxu0 %v3367_v12  ;;  %2518 = vmatpush1.bf16.msra.mxu1 %v3370_v13  ;;  %v373_v12 = vrot.slane %v4100_v32, %v372_v6  ;;  %v620_v13 = vadd.f32 %v4115_v47, %v361_v7  ;;  %v3451_v47 = vld [vmem:[%s4001_s16 + $0x5e0] ss:$16 sps:$4 sm:$0xff]   ;;  %v3514_v7 = vld [vmem:[%s4001_s16 + $0x728] ss:$16 sps:$4 sm:$0xff]  }
 0x1ce   : > { %2355 = vmatprep.subr.bf16.mxu0 %v3375_v15  ;;  %2519 = vmatprep.subr.bf16.mxu1 %v3378_v16  ;;  %v3445_v15 = vld [vmem:[%s4001_s16 + $0x5c0] ss:$16 sps:$4 sm:$0xff]   ;;  %v3448_v16 = vld [vmem:[%s4001_s16 + $0x5c8] ss:$16 sps:$4 sm:$0xff]  }
 0x1cf   : > { %v3511_v6 = vld [vmem:[%s4001_s16 + $0x720] ss:$16 sps:$4 sm:$0xff]  }
 0x1d1   : > { %2356 = vmatpush1.bf16.msra.mxu0 %v3373_v17  ;;  %2520 = vmatpush1.bf16.msra.mxu1 %v3376_v18  ;;  %v3453_v17 = vld [vmem:[%s4001_s16 + $0x5e4] ss:$16 sps:$4 sm:$0xff]   ;;  %v3456_v18 = vld [vmem:[%s4001_s16 + $0x5ec] ss:$16 sps:$4 sm:$0xff]  }
 0x1d2   : > { %2357 = vmatprep.subr.bf16.mxu0 %v3381_v19  ;;  %2521 = vmatprep.subr.bf16.mxu1 %v3384_v20  ;;  %v693_v19 = vadd.f32 %v4145_v14, %v373_v12  ;;  %v699_v20 = vmax.f32 %v620_v13, 0.0  ;;  %v3460_v14 = vld [vmem:[%s4001_s16 + $0x608] ss:$16 sps:$4 sm:$0xff]   ;;  %v3525_v12 = vld [vmem:[%s4001_s16 + $0x764] ss:$16 sps:$4 sm:$0xff]  }
 0x1d3   : > { %v3528_v13 = vld [vmem:[%s4001_s16 + $0x76c] ss:$16 sps:$4 sm:$0xff]  }
 0x1d5   : > { %2358 = vmatpush1.bf16.msra.mxu0 %v3379_v21  ;;  %2522 = vmatpush1.bf16.msra.mxu1 %v3382_v22  ;;  %v3454_v21 = vld [vmem:[%s4001_s16 + $0x5e8] ss:$16 sps:$4 sm:$0xff]   ;;  %v3459_v22 = vld [vmem:[%s4001_s16 + $0x604] ss:$16 sps:$4 sm:$0xff]  }
 0x1d6   : > { %2359 = vmatprep.subr.bf16.mxu0 %v3387_v23  ;;  %2523 = vmatprep.subr.bf16.mxu1 %v3390_v24  ;;  %v3462_v23 = vld [vmem:[%s4001_s16 + $0x60c] ss:$16 sps:$4 sm:$0xff]   ;;  %v702_v24 = vmax.f32 %v693_v19, 0.0  ;;  %v3529_v19 = vld [vmem:[%s4001_s16 + $0x780] ss:$16 sps:$4 sm:$0xff]  }
 0x1d9   : > { %2360 = vmatpush1.bf16.msra.mxu0 %v3385_v25  ;;  %2524 = vmatpush1.bf16.msra.mxu1 %v3388_v26  ;;  %v707_v25 = vpack.c.bf16 %v699_v20, %v699_v20  ;;  %v3457_v26 = vld [vmem:[%s4001_s16 + $0x600] ss:$16 sps:$4 sm:$0xff]   ;;  %v3532_v20 = vld [vmem:[%s4001_s16 + $0x788] ss:$16 sps:$4 sm:$0xff]  }
 0x1da   : > { %2361 = vmatprep.subr.bf16.mxu0 %v3393_v27  ;;  %2525 = vmatprep.subr.bf16.mxu1 %v3396_v28  ;;  %v3465_v27 = vld [vmem:[%s4001_s16 + $0x624] ss:$16 sps:$4 sm:$0xff]   ;;  %v3468_v28 = vld [vmem:[%s4001_s16 + $0x62c] ss:$16 sps:$4 sm:$0xff]  }
 0x1dd   : > { %2362 = vmatpush1.bf16.msra.mxu0 %v3391_v29  ;;  %2526 = vmatpush1.bf16.msra.mxu1 %v3394_v35  ;;  %v710_v29 = vpack.c.bf16 %v702_v24, %v702_v24  ;;  %v3463_v35 = vld [vmem:[%s4001_s16 + $0x620] ss:$16 sps:$4 sm:$0xff]   ;;  %v3538_v24 = vld [vmem:[%s4001_s16 + $0x7a8] ss:$16 sps:$4 sm:$0xff]  }
 0x1de   : > { %2363 = vmatprep.subr.bf16.mxu0 %v3399_v36  ;;  %2527 = vmatprep.subr.bf16.mxu1 %v3402_v37  ;;  %v3466_v36 = vld [vmem:[%s4001_s16 + $0x628] ss:$16 sps:$4 sm:$0xff]   ;;  %v3471_v37 = vld [vmem:[%s4001_s16 + $0x644] ss:$16 sps:$4 sm:$0xff]  }
 0x1e1   : > { %2364 = vmatpush1.bf16.msra.mxu0 %v3397_v38  ;;  %2528 = vmatpush1.bf16.msra.mxu1 %v3400_v39  ;;  %v3474_v38 = vld [vmem:[%s4001_s16 + $0x64c] ss:$16 sps:$4 sm:$0xff]   ;;  %v3469_v39 = vld [vmem:[%s4001_s16 + $0x640] ss:$16 sps:$4 sm:$0xff]  }
 0x1e2   : > { %2365 = vmatprep.subr.bf16.mxu0 %v3405_v40  ;;  %2529 = vmatprep.subr.bf16.mxu1 %v3408_v41  ;;  %v3472_v40 = vld [vmem:[%s4001_s16 + $0x648] ss:$16 sps:$4 sm:$0xff]   ;;  %v3477_v41 = vld [vmem:[%s4001_s16 + $0x664] ss:$16 sps:$4 sm:$0xff]  }
 0x1e5   : > { %2366 = vmatpush1.bf16.msra.mxu0 %v3403_v43  ;;  %2530 = vmatpush1.bf16.msra.mxu1 %v3406_v44  ;;  %v3480_v43 = vld [vmem:[%s4001_s16 + $0x66c] ss:$16 sps:$4 sm:$0xff]   ;;  %v3475_v44 = vld [vmem:[%s4001_s16 + $0x660] ss:$16 sps:$4 sm:$0xff]  }
 0x1e6   : > { %2367 = vmatprep.subr.bf16.mxu0 %v3411_v46  ;;  %2531 = vmatprep.subr.bf16.mxu1 %v3414_v49  ;;  %v3478_v46 = vld [vmem:[%s4001_s16 + $0x668] ss:$16 sps:$4 sm:$0xff]   ;;  %v3483_v49 = vld [vmem:[%s4001_s16 + $0x684] ss:$16 sps:$4 sm:$0xff]  }
 0x1e9   : > { %2368 = vmatpush1.bf16.msra.mxu0 %v3409_v50  ;;  %2532 = vmatpush1.bf16.msra.mxu1 %v3412_v51  ;;  %v3486_v50 = vld [vmem:[%s4001_s16 + $0x68c] ss:$16 sps:$4 sm:$0xff]   ;;  %v3481_v51 = vld [vmem:[%s4001_s16 + $0x680] ss:$16 sps:$4 sm:$0xff]  }
 0x1ea   : > { %2369 = vmatprep.subr.bf16.mxu0 %v3417_v52  ;;  %2533 = vmatprep.subr.bf16.mxu1 %v3420_v53  ;;  %v3484_v52 = vld [vmem:[%s4001_s16 + $0x688] ss:$16 sps:$4 sm:$0xff]   ;;  %v3489_v53 = vld [vmem:[%s4001_s16 + $0x6a4] ss:$16 sps:$4 sm:$0xff]  }
 0x1ed   : > { %2370 = vmatpush1.bf16.msra.mxu0 %v3415_v54  ;;  %2534 = vmatpush1.bf16.msra.mxu1 %v3418_v55  ;;  %v3492_v54 = vld [vmem:[%s4001_s16 + $0x6ac] ss:$16 sps:$4 sm:$0xff]   ;;  %v3487_v55 = vld [vmem:[%s4001_s16 + $0x6a0] ss:$16 sps:$4 sm:$0xff]  }
 0x1ee   : > { %2371 = vmatprep.subr.bf16.mxu0 %v3423_v56  ;;  %2535 = vmatprep.subr.bf16.mxu1 %v3426_v57  ;;  %v3490_v56 = vld [vmem:[%s4001_s16 + $0x6a8] ss:$16 sps:$4 sm:$0xff]   ;;  %v3495_v57 = vld [vmem:[%s4001_s16 + $0x6c4] ss:$16 sps:$4 sm:$0xff]  }
 0x1f1   : > { %2372 = vmatpush1.bf16.msra.mxu0 %v3421_v58  ;;  %2536 = vmatpush1.bf16.msra.mxu1 %v3424_v59  ;;  %v3498_v58 = vld [vmem:[%s4001_s16 + $0x6cc] ss:$16 sps:$4 sm:$0xff]   ;;  %v3493_v59 = vld [vmem:[%s4001_s16 + $0x6c0] ss:$16 sps:$4 sm:$0xff]  }
 0x1f2   : > { %2373 = vmatprep.subr.bf16.mxu0 %v3429_v60  ;;  %2537 = vmatprep.subr.bf16.mxu1 %v3432_v61  ;;  %v3496_v60 = vld [vmem:[%s4001_s16 + $0x6c8] ss:$16 sps:$4 sm:$0xff]   ;;  %v3501_v61 = vld [vmem:[%s4001_s16 + $0x6e4] ss:$16 sps:$4 sm:$0xff]  }
 0x1f5   : > { %2374 = vmatpush1.bf16.msra.mxu0 %v3427_v62  ;;  %2538 = vmatpush1.bf16.msra.mxu1 %v3430_v63  ;;  %v3504_v62 = vld [vmem:[%s4001_s16 + $0x6ec] ss:$16 sps:$4 sm:$0xff]   ;;  %v3499_v63 = vld [vmem:[%s4001_s16 + $0x6e0] ss:$16 sps:$4 sm:$0xff]  }
 0x1f6   : > { %2375 = vmatprep.subr.bf16.mxu0 %v3435_v0  ;;  %2539 = vmatprep.subr.bf16.mxu1 %v3438_v1  ;;  %v3502_v0 = vld [vmem:[%s4001_s16 + $0x6e8] ss:$16 sps:$4 sm:$0xff]   ;;  %v3507_v1 = vld [vmem:[%s4001_s16 + $0x704] ss:$16 sps:$4 sm:$0xff]  }
 0x1f9   : > { %2376 = vmatpush1.bf16.msra.mxu0 %v3433_v2  ;;  %2540 = vmatpush1.bf16.msra.mxu1 %v3436_v3  ;;  %v3505_v2 = vld [vmem:[%s4001_s16 + $0x700] ss:$16 sps:$4 sm:$0xff]   ;;  %v3508_v3 = vld [vmem:[%s4001_s16 + $0x708] ss:$16 sps:$4 sm:$0xff]  }
 0x1fa   : > { %2377 = vmatprep.subr.bf16.mxu0 %v3441_v4  ;;  %2541 = vmatprep.subr.bf16.mxu1 %v3444_v5  ;;  %v3513_v4 = vld [vmem:[%s4001_s16 + $0x724] ss:$16 sps:$4 sm:$0xff]   ;;  %v3516_v5 = vld [vmem:[%s4001_s16 + $0x72c] ss:$16 sps:$4 sm:$0xff]  }
 0x1fd   : > { %2378 = vmatpush1.bf16.msra.mxu0 %v3439_v48  ;;  %2542 = vmatpush1.bf16.msra.mxu1 %v3442_v8  ;;  %v3519_v48 = vld [vmem:[%s4001_s16 + $0x744] ss:$16 sps:$4 sm:$0xff]   ;;  %v3522_v8 = vld [vmem:[%s4001_s16 + $0x74c] ss:$16 sps:$4 sm:$0xff]  }
 0x1fe   : > { %2379 = vmatprep.subr.bf16.mxu0 %v3447_v9  ;;  %2543 = vmatprep.subr.bf16.mxu1 %v3450_v10  ;;  %v3517_v9 = vld [vmem:[%s4001_s16 + $0x740] ss:$16 sps:$4 sm:$0xff]   ;;  %v3520_v10 = vld [vmem:[%s4001_s16 + $0x748] ss:$16 sps:$4 sm:$0xff]  }
 0x201   : > { %2380 = vmatpush1.bf16.msra.mxu0 %v3445_v15  ;;  %2544 = vmatpush1.bf16.msra.mxu1 %v3448_v16  ;;  %v3523_v15 = vld [vmem:[%s4001_s16 + $0x760] ss:$16 sps:$4 sm:$0xff]   ;;  %v3526_v16 = vld [vmem:[%s4001_s16 + $0x768] ss:$16 sps:$4 sm:$0xff]  }
 0x202   : > { %2381 = vmatprep.subr.bf16.mxu0 %v3453_v17  ;;  %2545 = vmatprep.subr.bf16.mxu1 %v3456_v18  ;;  %v3531_v17 = vld [vmem:[%s4001_s16 + $0x784] ss:$16 sps:$4 sm:$0xff]   ;;  %v3534_v18 = vld [vmem:[%s4001_s16 + $0x78c] ss:$16 sps:$4 sm:$0xff]  }
 0x205   : > { %2382 = vmatpush1.bf16.msra.mxu0 %v3451_v47  ;;  %2546 = vmatpush1.bf16.msra.mxu1 %v3454_v21  ;;  %v368_v47 = vsub.s32 6, %v4097_v30  ;;  %v3537_v21 = vld [vmem:[%s4001_s16 + $0x7a4] ss:$16 sps:$4 sm:$0xff]  }
 0x206   : > { %2392 = vmatprep.subr.bf16.mxu0 %v3459_v22  ;;  %2556 = vmatprep.subr.bf16.mxu1 %v3462_v23  ;;  %v3540_v22 = vld [vmem:[%s4001_s16 + $0x7ac] ss:$16 sps:$4 sm:$0xff]   ;;  %v3535_v23 = vld [vmem:[%s4001_s16 + $0x7a0] ss:$16 sps:$4 sm:$0xff]  }
 0x208   : > { %2384 = vmatmul.mubr.bf16.vlgmr.msra.gmra.mrb[4].mxu0 %v707_v25  ;;  %2548 = vmatmul.mubr.bf16.vlgmr.msra.gmra.mrb[4].mxu1 %v707_v25  ;;  %v369_v25 = vrot.slane %v4100_v32, %v368_v47  ;;  %v3547_v32 = vld [vmem:[%s4001_s16 + $0x7e0] ss:$16 sps:$4 sm:$0xff]  }
 0x209   : > { %2393 = vmatpush1.bf16.msra.mxu0 %v3457_v26  ;;  %2557 = vmatpush1.bf16.msra.mxu1 %v3460_v14  ;;  %v3543_v26 = vld [vmem:[%s4001_s16 + $0x7c4] ss:$16 sps:$4 sm:$0xff]   ;;  %v3546_v14 = vld [vmem:[%s4001_s16 + $0x7cc] ss:$16 sps:$4 sm:$0xff]  }
 0x20a   : > { %2394 = vmatprep.subr.bf16.mxu0 %v3465_v27  ;;  %2558 = vmatprep.subr.bf16.mxu1 %v3468_v28  ;;  %v3541_v27 = vld [vmem:[%s4001_s16 + $0x7c0] ss:$16 sps:$4 sm:$0xff]   ;;  %v3544_v28 = vld [vmem:[%s4001_s16 + $0x7c8] ss:$16 sps:$4 sm:$0xff]  }
 0x20b   : > { %2424 = vmatprep.mubr.bf16.mxu0 %v710_v29  ;;  %2588 = vmatprep.mubr.bf16.mxu1 %v710_v29  ;;  %v691_v29 = vadd.f32 %v4141_v11, %v369_v25  ;;  %v967_v11 = vld [vmem:[%s283_s17] sm:$0xf] }
 0x20d   : > { %2395 = vmatpush1.bf16.msra.mxu0 %v3463_v35  ;;  %2559 = vmatpush1.bf16.msra.mxu1 %v3466_v36  ;;  %v3549_v35 = vld [vmem:[%s4001_s16 + $0x7e4] ss:$16 sps:$4 sm:$0xff]   ;;  %v3552_v36 = vld [vmem:[%s4001_s16 + $0x7ec] ss:$16 sps:$4 sm:$0xff]  }
 0x20e   : > { %2396 = vmatprep.subr.bf16.mxu0 %v3471_v37  ;;  %2560 = vmatprep.subr.bf16.mxu1 %v3474_v38  ;;  %v3550_v37 = vld [vmem:[%s4001_s16 + $0x7e8] ss:$16 sps:$4 sm:$0xff]   ;;  %v701_v38 = vmax.f32 %v691_v29, 0.0 }
 0x211   : > { %2397 = vmatpush1.bf16.msra.mxu0 %v3469_v39  ;;  %2561 = vmatpush1.bf16.msra.mxu1 %v3472_v40  ;;  %v709_v39 = vpack.c.bf16 %v701_v38, %v701_v38  ;;  %v3752_v40 = vmov 1983009808  }
 0x212   : > { %2398 = vmatprep.subr.bf16.mxu0 %v3477_v41  ;;  %2562 = vmatprep.subr.bf16.mxu1 %v3480_v43  ;;  %v2608_v41 = vunpack.c.l.s4 %v3752_v40  ;;  %v972_v43 = vrot.slane %v967_v11, %v344_v31 }
 0x215   : > { %2399 = vmatpush1.bf16.msra.mxu0 %v3475_v44  ;;  %2563 = vmatpush1.bf16.msra.mxu1 %v3478_v46  ;;  %v980_v44 = vrot.slane %v967_v11, %v352_v45  ;;  %v976_v46 = vrot.slane %v967_v11, %v348_v33 }
 0x216   : > { %2400 = vmatprep.subr.bf16.mxu0 %v3483_v49  ;;  %2564 = vmatprep.subr.bf16.mxu1 %v3486_v50  ;;  %v984_v49 = vrot.slane %v967_v11, %v356_v34 }
 0x219   : > { %2401 = vmatpush1.bf16.msra.mxu0 %v3481_v51  ;;  %2565 = vmatpush1.bf16.msra.mxu1 %v3484_v52  ;;  %v2609_v52 = vunpack.c.0.s8 %v2608_v41 }
 0x21a   : > { %2402 = vmatprep.subr.bf16.mxu0 %v3489_v53  ;;  %2566 = vmatprep.subr.bf16.mxu1 %v3492_v54 }
 0x21d   : > { %2403 = vmatpush1.bf16.msra.mxu0 %v3487_v55  ;;  %2567 = vmatpush1.bf16.msra.mxu1 %v3490_v56 }
 0x21e   : > { %2404 = vmatprep.subr.bf16.mxu0 %v3495_v57  ;;  %2568 = vmatprep.subr.bf16.mxu1 %v3498_v58 }
 0x221   : > { %2405 = vmatpush1.bf16.msra.mxu0 %v3493_v59  ;;  %2569 = vmatpush1.bf16.msra.mxu1 %v3496_v60 }
 0x222   : > { %2406 = vmatprep.subr.bf16.mxu0 %v3501_v61  ;;  %2570 = vmatprep.subr.bf16.mxu1 %v3504_v62 }
 0x225   : > { %2407 = vmatpush1.bf16.msra.mxu0 %v3499_v63  ;;  %2571 = vmatpush1.bf16.msra.mxu1 %v3502_v0  ;;  %v2612_v63 = vsub.s32 %v2609_v52, %v4097_v30 }
 0x226   : > { %2408 = vmatprep.subr.bf16.mxu0 %v3507_v1  ;;  %2572 = vmatprep.subr.bf16.mxu1 %v3510_v42 }
 0x229   : > { %2409 = vmatpush1.bf16.msra.mxu0 %v3505_v2  ;;  %2573 = vmatpush1.bf16.msra.mxu1 %v3508_v3 }
 0x22a   : > { %2410 = vmatprep.subr.bf16.mxu0 %v3513_v4  ;;  %2574 = vmatprep.subr.bf16.mxu1 %v3516_v5 }
 0x22d   : > { %2411 = vmatpush1.bf16.msra.mxu0 %v3511_v6  ;;  %2575 = vmatpush1.bf16.msra.mxu1 %v3514_v7 }
 0x22e   : > { %2412 = vmatprep.subr.bf16.mxu0 %v3519_v48  ;;  %2576 = vmatprep.subr.bf16.mxu1 %v3522_v8 }
 0x231   : > { %2413 = vmatpush1.bf16.msra.mxu0 %v3517_v9  ;;  %2577 = vmatpush1.bf16.msra.mxu1 %v3520_v10 }
 0x232   : > { %2414 = vmatprep.subr.bf16.mxu0 %v3525_v12  ;;  %2578 = vmatprep.subr.bf16.mxu1 %v3528_v13 }
 0x235   : > { %2415 = vmatpush1.bf16.msra.mxu0 %v3523_v15  ;;  %2579 = vmatpush1.bf16.msra.mxu1 %v3526_v16 }
 0x236   : > { %2416 = vmatprep.subr.bf16.mxu0 %v3531_v17  ;;  %2580 = vmatprep.subr.bf16.mxu1 %v3534_v18 }
 0x239   : > { %2417 = vmatpush1.bf16.msra.mxu0 %v3529_v19  ;;  %2581 = vmatpush1.bf16.msra.mxu1 %v3532_v20 }
 0x23a   : > { %2418 = vmatprep.subr.bf16.mxu0 %v3537_v21  ;;  %2582 = vmatprep.subr.bf16.mxu1 %v3540_v22 }
 0x23d   : > { %2419 = vmatpush1.bf16.msra.mxu0 %v3535_v23  ;;  %2583 = vmatpush1.bf16.msra.mxu1 %v3538_v24 }
 0x23e   : > { %2420 = vmatprep.subr.bf16.mxu0 %v3543_v26  ;;  %2584 = vmatprep.subr.bf16.mxu1 %v3546_v14 }
 0x241   : > { %2421 = vmatpush1.bf16.msra.mxu0 %v3541_v27  ;;  %2585 = vmatpush1.bf16.msra.mxu1 %v3544_v28 }
 0x242   : > { %2422 = vmatprep.subr.bf16.mxu0 %v3549_v35  ;;  %2586 = vmatprep.subr.bf16.mxu1 %v3552_v36 }
 0x245   : > { %2423 = vmatpush1.bf16.msra.mxu0 %v3547_v32  ;;  %2587 = vmatpush1.bf16.msra.mxu1 %v3550_v37 }
 0x248   : > { %2425 = vmatmul.mubr.bf16.vlgmr.msra.gmra.mrb[4].mxu0 %v709_v39  ;;  %2589 = vmatmul.mubr.bf16.vlgmr.msra.gmra.mrb[4].mxu1 %v709_v39 }
 0x31b   : > { %v2426_v50 = vpop.f32.mrb[4].mxu0  ;;  %v2590_v51 = vpop.f32.mrb[4].mxu1 }
 0x31c   : > { %v3059_v53 = vadd.f32 %v2426_v50, %v972_v43  ;;  %v3061_v54 = vadd.f32 %v2590_v51, %v980_v44  ;;  %v2428_v55 = vpop.f32.mrb[5].mxu0  ;;  %v2592_v56 = vpop.f32.mrb[5].mxu1 }
 0x31d   : > { %v3060_v57 = vadd.f32 %v2428_v55, %v976_v46  ;;  %v3062_v31 = vadd.f32 %v2592_v56, %v984_v49  ;;  %v2430_v58 = vpop.f32.mrb[6].mxu0  ;;  %v2594_v59 = vpop.f32.mrb[6].mxu1 }
 0x31e   : > { %v2597_v45 = vmax.f32 %v3059_v53, 0.0  ;;  %v2599_v60 = vmax.f32 %v3061_v54, 0.0  ;;  %v2431_v61 = vpop.f32.mrb[7].mxu0  ;;  %v2595_v33 = vpop.f32.mrb[7].mxu1 }
 0x31f   : > { %v2598_v62 = vmax.f32 %v3060_v57, 0.0  ;;  %v2600_v34 = vmax.f32 %v3062_v31, 0.0 }
 0x321   : > { %v2605_v0 = vcombine.low %v2597_v45, %v2598_v62  ;;  %v2606_v1 = vcombine.low %v2599_v60, %v2600_v34 }
 0x323   : > { %v2613_v42 = vrot.slane %v2605_v0, %v2612_v63  ;;  %v2620_v2 = vrot.slane %v2606_v1, %v2612_v63 }
 0x325   : > { %v2621_v3 = vcombine.low %v2613_v42, %v2620_v2 }
 0x327   : > { %2623 = vst [vmem:[%s321_s7] sm:$0xff] %v2621_v3 }
 0x328 PF: > { %s4394_s30 = sld [smem:[#allocation13_spill]]  ;;  %p17_p4 = scmp.ge.s32.totalorder %s3805_s23, 6  }
 0x329   : > { %s4395_s18 = smov %s3731_s19  ;;  %s4396_s19 = smov %s3735_s20 }
 0x32a   : > { %s4398_s21 = smov %s3805_s23  ;;  %19 = sbr.rel (!%p17_p4) target bundleno = 7 (0x7), region = 104 }
 0x32e   : > { %s4397_s20 = smov %s4394_s30 }
 0x331   :  { %2646 = vsyncpa [#allocation3], 1 }
 0x332   :  { %2648 = vsyncpa [#allocation3 + $0x1], 1 }
 0x333   :  { %2649 = vsyncpa [#allocation5], 1 }
 0x334   :  { %2650 = vsyncpa [#allocation8], 1 }
 0x335   :  { %2652 = vsyncpa [#allocation8 + $0x1], 1 }

// kernel: decoder_forward.5
= control target key start
LH: loop header
LB: loop body
LE: loop exit
PB: predicated region body
PF: predicated region fallthrough
CT: control target
= control target key end

     0   :  { %s614_s9 = smov 0   ;;  %s616_s10 = smov 0   ;;  %s670_s0 = inlined_call_operand.vmem [shape: f32[128,64], index: 0, kind: input, shape index: {}]   ;;  %s671_s1 = inlined_call_operand.vmem [shape: bf16[64,128], index: 1, kind: input, shape index: {}]   ;;  %s672_s2 = inlined_call_operand.vmem [shape: f32[128,128], index: 2, kind: output, shape index: {}]  }
   0x1   :  { %s618_s11 = smov 0  }
   0x2 LB: > { %s31_s12 = sadd.s32 1, %s593_s10  ;;  %p500_p0 = scmp.ge.s32.totalorder %s597_s11, 1  ;;  %s597_s11 = sphi %s618_s11, %s12_s11   ;;  %s593_s10 = sphi %s616_s10, %s674_s10   ;;  %s589_s9 = sphi %s614_s9, %s673_s9  }
   0x3   : > { %p33_p1 = scmp.ge.s32.totalorder %s31_s12, 2  ;;  %p155_p2 = scmp.lt.s32.totalorder %s597_s11, 3 }
   0x5   : > { %s676_s12 = smov (%p33_p1, %s31_s12), 0  ;;  %p156_p3 = pnand %p500_p0, %p155_p2 }
   0x6   : > { %v571_v0 = vld [vmem:[%s671_s1] sm:$0xff] (!%p156_p3)   ;;  %s501_s15 = sshll.u32 (!%p156_p3), %s589_s9, 3  ;;  %v572_v1 = vld [vmem:[%s671_s1 + $0x8] sm:$0xff] (!%p156_p3)   ;;  %v573_v2 = vld [vmem:[%s671_s1 + $0x10] sm:$0xff] (!%p156_p3)   ;;  %vm283_vm0 = vcmask (!%p156_p3), 523264  }
   0x7   : > { %159 = sbr.rel (%p156_p3) target bundleno = 240 (0xf0), region = 28  ;;  %p192_p4 = scmp.lt.s32.totalorder (!%p156_p3), %s501_s15, 15  ;;  %523 = vmatprep.subr.bf16.mxu0 (!%p156_p3), %v571_v0  ;;  %539 = vmatprep.subr.bf16.mxu1 (!%p156_p3), %v571_v0  ;;  %v574_v6 = vld [vmem:[%s671_s1 + $0x18] sm:$0xff] (!%p156_p3)  }
   0x8   : > { %524 = vmatpush3.bf16.msra.mxu0 (!%p156_p3), %v571_v0  ;;  %543 = vmatpush3.bf16.msra.mxu1 (!%p156_p3), %v571_v0 }
   0x9   : > { %525 = vmatprep.subr.bf16.mxu0 (!%p156_p3), %v572_v1  ;;  %540 = vmatprep.subr.bf16.mxu1 (!%p156_p3), %v572_v1 }
   0xc   : > { %526 = vmatpush3.bf16.msra.mxu0 (!%p156_p3), %v572_v1  ;;  %544 = vmatpush3.bf16.msra.mxu1 (!%p156_p3), %v572_v1 }
   0xd   : > { %527 = vmatprep.subr.bf16.mxu0 (!%p156_p3), %v573_v2  ;;  %541 = vmatprep.subr.bf16.mxu1 (!%p156_p3), %v573_v2 }
   0xe   : > { %s678_s15 = smov (!%p192_p4, %s501_s15), 15 }
   0xf   : > { %s502_s20 = sshll.u32 %s678_s15, 3 }
  0x10   : > { %s198_s23 = scalar_lea.vmem %s670_s0, %s502_s20  ;;  %528 = vmatpush3.bf16.msra.mxu0 %v573_v2  ;;  %545 = vmatpush3.bf16.msra.mxu1 %v573_v2  ;;  %s216_s28 = scalar_lea.vmem %s672_s2, %s502_s20 }
  0x11   : > { %v239_v3 = vld [vmem:[%s198_s23] sm:$0xff]  ;;  %v240_v4 = vld [vmem:[%s198_s23 + $0x8] sm:$0xff]  ;;  %v241_v10 = vld [vmem:[%s198_s23 + $0x10] sm:$0xff]  ;;  %529 = vmatprep.subr.bf16.mxu0 %v574_v6  ;;  %542 = vmatprep.subr.bf16.mxu1 %v574_v6 }
  0x12   : > { %v243_v5 = vld [vmem:[%s198_s23 + $0x20] sm:$0xff]  ;;  %v247_v7 = vpack.c.bf16 %v240_v4, %v239_v3  ;;  %v244_v8 = vld [vmem:[%s198_s23 + $0x28] sm:$0xff]  ;;  %v242_v11 = vld [vmem:[%s198_s23 + $0x18] sm:$0xff] }
  0x13   : > { %v249_v9 = vpack.c.bf16 %v244_v8, %v243_v5  ;;  %v245_v12 = vld [vmem:[%s198_s23 + $0x30] sm:$0xff]  ;;  %v246_v13 = vld [vmem:[%s198_s23 + $0x38] sm:$0xff]  ;;  %v248_v14 = vpack.c.bf16 %v242_v11, %v241_v10 }
  0x14   : > { %531 = vmatprep.mubr.msk.bf16.mxu0 %vm283_vm0, %v247_v7  ;;  %v250_v15 = vpack.c.bf16 %v246_v13, %v245_v12  ;;  %530 = vmatpush3.bf16.msra.mxu0 %v574_v6 }
  0x15   : > { %535 = vmatprep.mubr.msk.bf16.mxu1 %vm283_vm0, %v249_v9  ;;  %546 = vmatpush3.bf16.msra.mxu1 %v574_v6 }
  0x17   : > { %532 = vmatmul.mubr.msk.bf16.vlgmr.msra.gmra.mrb[0].mxu0 %vm283_vm0, %v248_v14 }
  0x18   : > { %536 = vmatmul.mubr.msk.bf16.vlgmr.msra.gmra.mrb[0].mxu1 %vm283_vm0, %v250_v15 }
  0xea   : > { %v533_v16 = vpop.f32.mrb[0].mxu0 }
  0xeb   : > { %v537_v17 = vpop.f32.mrb[0].mxu1  ;;  %390 = vst [vmem:[%s216_s28 + $0x10] sm:$0xff] %v533_v16  ;;  %v330_v18 = vpop.f32.mrb[1].mxu0 }
  0xec   : > { %394 = vst [vmem:[%s216_s28 + $0x30] sm:$0xff] %v537_v17  ;;  %v346_v19 = vpop.f32.mrb[1].mxu1  ;;  %388 = vst [vmem:[%s216_s28] sm:$0xff] %v330_v18  ;;  %v534_v20 = vpop.f32.mrb[2].mxu0 }
  0xed   : > { %392 = vst [vmem:[%s216_s28 + $0x20] sm:$0xff] %v346_v19  ;;  %v538_v21 = vpop.f32.mrb[2].mxu1  ;;  %391 = vst [vmem:[%s216_s28 + $0x18] sm:$0xff] %v534_v20  ;;  %v333_v22 = vpop.f32.mrb[3].mxu0 }
  0xee   : > { %395 = vst [vmem:[%s216_s28 + $0x38] sm:$0xff] %v538_v21  ;;  %v349_v23 = vpop.f32.mrb[3].mxu1  ;;  %389 = vst [vmem:[%s216_s28 + $0x8] sm:$0xff] %v333_v22 }
  0xef   : > { %393 = vst [vmem:[%s216_s28 + $0x28] sm:$0xff] %v349_v23 }
  0xf0 PF: > { %s12_s11 = sadd.s32 1, %s597_s11   ;;  %s673_s9 = smov %s593_s10 }
  0xf1   : > { %p9_p5 = scmp.ge.s32.totalorder %s12_s11, 4   ;;  %s674_s10 = smov %s676_s12 }
  0xf3   :  { %11 = sbr.rel (!%p9_p5) target bundleno = 2 (0x2), region = 69 }

</bundles_post_ra>
